<compile_context>
chip_gen: v7x
topology: tpu7x:2x2x1
jax: 0.10.0
libtpu: 0.0.40
codegen_flags: <defaults>
</compile_context>

<pallas_src>
import functools

import jax
import jax.numpy as jnp
from jax.experimental import pallas as pl
from jax.experimental.pallas import tpu as pltpu


def _critic_kernel(attn_mem_ref, lstm_w_ref, rows_ref, mats_ref, out_ref,
                   *, n_hop, num_outputs, H, D):
    attn_mem = attn_mem_ref[...]                       # [N, D]
    lstm_w = lstm_w_ref[...]                           # [D+H, 4H]  (wih stacked on whh)

    # --- unpack the packed row-vector slab (static prefix slices, cheap) ---
    bias    = rows_ref[0:1, 0:4 * H]                   # [1, 4H]  (b_ih + b_hh)
    init_h  = rows_ref[1:2, 0:H]                       # [1, H]
    init_c  = rows_ref[2:3, 0:H]                       # [1, H]
    init_i  = rows_ref[3:4, 0:D]                       # [1, D]
    attn_v  = rows_ref[4:5, 0:H]                       # [1, H]   (row form of [H,1])
    hop_v   = rows_ref[5:6, 0:H]                       # [1, H]
    score_w = rows_ref[6:7, 0:D]                       # [1, D]   (row form of [D,1])
    score_b = rows_ref[7:8, 0:1]                       # [1, 1]

    # --- unpack the matrix slab (static sublane slices at multiples of 8) ---
    attn_wm = mats_ref[0:D, :]                         # [D, H]
    hop_wm  = mats_ref[D:2 * D, :]                     # [D, H]
    attn_wq = mats_ref[2 * D:2 * D + H, :]             # [H, H]
    hop_wq  = mats_ref[2 * D + H:2 * D + 2 * H, :]     # [H, H]

    # --- step-invariant feature projections, hoisted out of the decode loop ---
    attn_feat = jnp.dot(attn_mem, attn_wm, preferred_element_type=jnp.float32)  # [N, H]
    hop_feat  = jnp.dot(attn_mem, hop_wm,  preferred_element_type=jnp.float32)  # [N, H]

    def attention(attn, feat, query, v_row, wq):
        # sum_  = feat + query @ w                                  [N, H]
        # logit = tanh(sum_) . v   (lane reduce, no MXU/transpose)  [N, 1]
        # score = softmax over sentences (sublane axis)             [N, 1]
        # out   = sum_n score_n * attn_n (sublane reduce)           [1, attn_dim]
        s = feat + jnp.dot(query, wq, preferred_element_type=jnp.float32)
        logits = jnp.sum(jnp.tanh(s) * v_row, axis=-1, keepdims=True)
        m = jnp.max(logits, axis=0, keepdims=True)
        e = jnp.exp(logits - m)
        score = e * pl.reciprocal(jnp.sum(e, axis=0, keepdims=True), approx=True)
        return jnp.sum(score * attn, axis=0, keepdims=True)

    def step(t, carry):
        x, h, c = carry

        # ---- LSTM cell: single fused gate matmul (PyTorch i,f,g,o order) ----
        xh = jnp.concatenate([x, h], axis=-1)                               # [1, D+H]
        gates = (jnp.dot(xh, lstm_w, preferred_element_type=jnp.float32)
                 + bias)                                                    # [1, 4H]
        i_g = jax.nn.sigmoid(gates[:, 0:H])
        f_g = jax.nn.sigmoid(gates[:, H:2 * H])
        g_g = jnp.tanh(gates[:, 2 * H:3 * H])
        o_g = jax.nn.sigmoid(gates[:, 3 * H:4 * H])
        c_new = f_g * c + i_g * g_g
        h_new = o_g * jnp.tanh(c_new)

        # ---- glimpse hops + final attention over raw memory ----
        q = h_new
        for _ in range(n_hop):
            q = attention(hop_feat, hop_feat, q, hop_v, hop_wq)
        output = attention(attn_mem, attn_feat, q, attn_v, attn_wq)          # [1, D]

        # ---- scalar score head on the VPU (no [1,D]@[D,1] matmul) ----
        score_val = (jnp.sum(output * score_w, axis=-1, keepdims=True)
                     + score_b)                                              # [1, 1]
        out_ref[pl.ds(t, 1), :] = score_val
        return (output, h_new, c_new)

    jax.lax.fori_loop(0, num_outputs, step, (init_i, init_h, init_c), unroll=True)


def critic_scorer_pallas(attn_mem, params, num_outputs, n_hop):
    """Runs the critic for `num_outputs` sequential decode steps; returns [num_outputs, 1]."""
    N, D = attn_mem.shape
    H = params["init_h"].shape[-1]
    # Packing uses static sublane slices -> require 8-multiple dims (true for real configs).
    assert D % 8 == 0 and H % 8 == 0, (D, H)

    # ---- pack parameters into a few lane-dense slabs (fewer, bigger DMAs) ----
    lstm_w = jnp.concatenate([params["wih_t"], params["whh_t"]], axis=0)     # [D+H, 4H]
    mats = jnp.concatenate([params["attn_wm"], params["hop_wm"],
                            params["attn_wq"], params["hop_wq"]], axis=0)    # [2D+2H, H]

    W = max(4 * H, D)

    def row(v):
        v = jnp.asarray(v, jnp.float32).reshape(1, -1)
        return jnp.pad(v, ((0, 0), (0, W - v.shape[-1])))

    rows = jnp.concatenate([
        row(params["bias"]),                    # 0: fused LSTM bias      [1, 4H]
        row(params["init_h"]),                  # 1
        row(params["init_c"]),                  # 2
        row(params["init_i"]),                  # 3
        row(params["attn_v"]),                  # 4: v as a row           [1, H]
        row(params["hop_v"]),                   # 5
        row(params["score_w"]),                 # 6: score weight as row  [1, D]
        row(params["score_b"]),                 # 7
    ], axis=0)                                                               # [8, W]

    in_arrays = (attn_mem, lstm_w, rows, mats)
    # Everything is small and step-invariant: one resident full-array block each.
    in_specs = [pl.BlockSpec(a.shape, lambda t: (0, 0)) for a in in_arrays]

    kernel = functools.partial(_critic_kernel, n_hop=n_hop,
                               num_outputs=num_outputs, H=H, D=D)

    return pl.pallas_call(
        kernel,
        out_shape=jax.ShapeDtypeStruct((num_outputs, 1), jnp.float32),
        grid_spec=pltpu.PrefetchScalarGridSpec(
            num_scalar_prefetch=0,
            grid=(1,),                                  # whole recurrence in one kernel invocation
            in_specs=in_specs,
            out_specs=pl.BlockSpec((num_outputs, 1), lambda t: (0, 0)),
        ),
        compiler_params=pltpu.CompilerParams(
            dimension_semantics=("arbitrary",)),        # strictly sequential recurrence
    )(*in_arrays)


def critic_scorer_reference(attn_mem, p, num_outputs, n_hop):
    """Pure-JAX reference mirroring the PyTorch forward (initial_summ=None)."""
    H = p["init_h"].shape[-1]
    h, c, x = p["init_h"], p["init_c"], p["init_i"]

    def attention(attn, feat, q, v, w):
        s = feat + q @ w
        logits = (jnp.tanh(s) @ v).T
        sc = jax.nn.softmax(logits, axis=-1)
        return sc @ attn

    scores = []
    for _ in range(num_outputs):
        gates = x @ p["wih_t"] + h @ p["whh_t"] + p["bias"]
        i = jax.nn.sigmoid(gates[:, :H])
        f = jax.nn.sigmoid(gates[:, H:2 * H])
        g = jnp.tanh(gates[:, 2 * H:3 * H])
        o = jax.nn.sigmoid(gates[:, 3 * H:])
        c = f * c + i * g
        h = o * jnp.tanh(c)
        attn_feat = attn_mem @ p["attn_wm"]
        hop_feat = attn_mem @ p["hop_wm"]
        q = h
        for _ in range(n_hop):
            q = attention(hop_feat, hop_feat, q, p["hop_v"], p["hop_wq"])
        out = attention(attn_mem, attn_feat, q, p["attn_v"], p["attn_wq"])
        scores.append(out @ p["score_w"] + p["score_b"])
        x = out
    return jnp.concatenate(scores, axis=0)


def make_params(key, input_dim, hidden):
    """Deterministic synthetic parameters (module copies them from an LSTMPointerNet)."""
    ks = jax.random.split(key, 16)
    u = lambda k, shape, s=0.1: jax.random.uniform(k, shape, jnp.float32, -s, s)
    D, H = input_dim, hidden
    params = {
        "init_i":  u(ks[0], (1, D)),            # _init_i.unsqueeze(0)
        "init_h":  u(ks[1], (1, H)),            # n_layer = 1
        "init_c":  u(ks[2], (1, H)),
        # LSTMCell weights, pre-transposed so kernel does x @ W; bias = b_ih + b_hh
        "wih_t":   u(ks[3], (D, 4 * H)),
        "whh_t":   u(ks[4], (H, 4 * H)),
        "bias":    u(ks[5], (1, 4 * H)),
        "attn_wm": u(ks[6], (D, H)),
        "attn_wq": u(ks[7], (H, H)),
        "attn_v":  u(ks[8], (H, 1)),            # _attn_v.unsqueeze(1)
        "hop_wm":  u(ks[9], (D, H)),
        "hop_wq":  u(ks[10], (H, H)),
        "hop_v":   u(ks[11], (H, 1)),
        "score_w": u(ks[12], (D, 1)),           # Linear(input_dim, 1), pre-transposed
        "score_b": u(ks[13], (1, 1)),
    }
    return params


if __name__ == "__main__":
    key = jax.random.PRNGKey(0)
    k_mem, k_par = jax.random.split(key)

    num_sents, input_dim, hidden = 8, 32, 32
    n_hop, num_outputs = 2, 3

    attn_mem = jax.random.normal(k_mem, (num_sents, input_dim), jnp.float32)
    params = make_params(k_par, input_dim, hidden)

    scores = critic_scorer_pallas(attn_mem, params, num_outputs, n_hop)
    scores = jax.block_until_ready(scores)

    ref = critic_scorer_reference(attn_mem, params, num_outputs, n_hop)
    assert scores.shape == (num_outputs, 1)
    # Tolerance accommodates the EUP approx reciprocal in the softmax normalizer.
    assert jnp.allclose(scores, ref, atol=1e-3, rtol=1e-3), (scores, ref)

    print("KERNEL_OK")
</pallas_src>

<mosaic_0001>
module attributes {stable_mosaic.version = 11 : i64} {
  func.func @_critic_kernel(%arg0: i32, %arg1: memref<8x32xf32, #tpu.memory_space<vmem>>, %arg2: memref<64x128xf32, #tpu.memory_space<vmem>>, %arg3: memref<8x128xf32, #tpu.memory_space<vmem>>, %arg4: memref<128x32xf32, #tpu.memory_space<vmem>>, %arg5: memref<3x1xf32, #tpu.memory_space<vmem>>) attributes {dimension_semantics = [#tpu.dimension_semantics<arbitrary>], iteration_bounds = array<i64: 1>, scalar_prefetch = 0 : i64, scratch_operands = 0 : i64, tpu.core_type = #tpu.core_type<tc>, window_params = [{pipeline_mode = #tpu.pipeline_mode<synchronous>, transform_indices = @transform_0, window_bounds = array<i64: 8, 32>}, {pipeline_mode = #tpu.pipeline_mode<synchronous>, transform_indices = @transform_1, window_bounds = array<i64: 64, 128>}, {pipeline_mode = #tpu.pipeline_mode<synchronous>, transform_indices = @transform_2, window_bounds = array<i64: 8, 128>}, {pipeline_mode = #tpu.pipeline_mode<synchronous>, transform_indices = @transform_3, window_bounds = array<i64: 128, 32>}, {pipeline_mode = #tpu.pipeline_mode<synchronous>, transform_indices = @transform_4, window_bounds = array<i64: 3, 1>}]} {
    %c0 = arith.constant 0 : index
    %c0_0 = arith.constant 0 : index
    %0 = vector.load %arg1[%c0, %c0_0] : memref<8x32xf32, #tpu.memory_space<vmem>>, vector<8x32xf32>
    %c0_1 = arith.constant 0 : index
    %c0_2 = arith.constant 0 : index
    %1 = vector.load %arg2[%c0_1, %c0_2] : memref<64x128xf32, #tpu.memory_space<vmem>>, vector<64x128xf32>
    %c0_3 = arith.constant 0 : index
    %c0_4 = arith.constant 0 : index
    %2 = vector.load %arg3[%c0_3, %c0_4] : memref<8x128xf32, #tpu.memory_space<vmem>>, vector<1x128xf32>
    %c1 = arith.constant 1 : index
    %c0_5 = arith.constant 0 : index
    %3 = vector.load %arg3[%c1, %c0_5] : memref<8x128xf32, #tpu.memory_space<vmem>>, vector<1x32xf32>
    %c2 = arith.constant 2 : index
    %c0_6 = arith.constant 0 : index
    %4 = vector.load %arg3[%c2, %c0_6] : memref<8x128xf32, #tpu.memory_space<vmem>>, vector<1x32xf32>
    %c3 = arith.constant 3 : index
    %c0_7 = arith.constant 0 : index
    %5 = vector.load %arg3[%c3, %c0_7] : memref<8x128xf32, #tpu.memory_space<vmem>>, vector<1x32xf32>
    %c4 = arith.constant 4 : index
    %c0_8 = arith.constant 0 : index
    %6 = vector.load %arg3[%c4, %c0_8] : memref<8x128xf32, #tpu.memory_space<vmem>>, vector<1x32xf32>
    %c5 = arith.constant 5 : index
    %c0_9 = arith.constant 0 : index
    %7 = vector.load %arg3[%c5, %c0_9] : memref<8x128xf32, #tpu.memory_space<vmem>>, vector<1x32xf32>
    %c6 = arith.constant 6 : index
    %c0_10 = arith.constant 0 : index
    %8 = vector.load %arg3[%c6, %c0_10] : memref<8x128xf32, #tpu.memory_space<vmem>>, vector<1x32xf32>
    %c7 = arith.constant 7 : index
    %c0_11 = arith.constant 0 : index
    %9 = vector.load %arg3[%c7, %c0_11] : memref<8x128xf32, #tpu.memory_space<vmem>>, vector<1x1xf32>
    %c0_12 = arith.constant 0 : index
    %c0_13 = arith.constant 0 : index
    %10 = vector.load %arg4[%c0_12, %c0_13] : memref<128x32xf32, #tpu.memory_space<vmem>>, vector<32x32xf32>
    %c32 = arith.constant 32 : index
    %c0_14 = arith.constant 0 : index
    %11 = vector.load %arg4[%c32, %c0_14] : memref<128x32xf32, #tpu.memory_space<vmem>>, vector<32x32xf32>
    %c64 = arith.constant 64 : index
    %c0_15 = arith.constant 0 : index
    %12 = vector.load %arg4[%c64, %c0_15] : memref<128x32xf32, #tpu.memory_space<vmem>>, vector<32x32xf32>
    %c96 = arith.constant 96 : index
    %c0_16 = arith.constant 0 : index
    %13 = vector.load %arg4[%c96, %c0_16] : memref<128x32xf32, #tpu.memory_space<vmem>>, vector<32x32xf32>
    %cst = arith.constant dense<0.000000e+00> : vector<8x32xf32>
    %14 = tpu.matmul %0, %10, %cst {dimension_numbers = #tpu.dot_dimension_numbers<[1], [0], [0], [1], [0, 0, 1, 1], [], []>} : vector<8x32xf32>, vector<32x32xf32>, vector<8x32xf32> -> vector<8x32xf32>
    %cst_17 = arith.constant dense<0.000000e+00> : vector<8x32xf32>
    %15 = tpu.matmul %0, %11, %cst_17 {dimension_numbers = #tpu.dot_dimension_numbers<[1], [0], [0], [1], [0, 0, 1, 1], [], []>} : vector<8x32xf32>, vector<32x32xf32>, vector<8x32xf32> -> vector<8x32xf32>
    %c0_i32 = arith.constant 0 : i32
    %16 = tpu.concatenate %5, %3 in 1 : vector<1x32xf32>, vector<1x32xf32> -> vector<1x64xf32>
    %cst_18 = arith.constant dense<0.000000e+00> : vector<1x128xf32>
    %17 = tpu.matmul %16, %1, %cst_18 {dimension_numbers = #tpu.dot_dimension_numbers<[1], [0], [0], [1], [0, 0, 1, 1], [], []>} : vector<1x64xf32>, vector<64x128xf32>, vector<1x128xf32> -> vector<1x128xf32>
    %18 = arith.addf %17, %2 : vector<1x128xf32>
    %19 = vector.extract_strided_slice %18 {offsets = [0, 0], sizes = [1, 32], strides = [1, 1]} : vector<1x128xf32> to vector<1x32xf32>
    %20 = arith.negf %19 : vector<1x32xf32>
    %21 = math.exp %20 : vector<1x32xf32>
    %cst_19 = arith.constant 1.000000e+00 : f32
    %22 = vector.broadcast %cst_19 : f32 to vector<1x32xf32>
    %23 = arith.addf %22, %21 : vector<1x32xf32>
    %24 = arith.divf %22, %23 : vector<1x32xf32>
    %25 = vector.extract_strided_slice %18 {offsets = [0, 32], sizes = [1, 32], strides = [1, 1]} : vector<1x128xf32> to vector<1x32xf32>
    %26 = arith.negf %25 : vector<1x32xf32>
    %27 = math.exp %26 : vector<1x32xf32>
    %cst_20 = arith.constant 1.000000e+00 : f32
    %28 = vector.broadcast %cst_20 : f32 to vector<1x32xf32>
    %29 = arith.addf %28, %27 : vector<1x32xf32>
    %30 = arith.divf %28, %29 : vector<1x32xf32>
    %31 = vector.extract_strided_slice %18 {offsets = [0, 64], sizes = [1, 32], strides = [1, 1]} : vector<1x128xf32> to vector<1x32xf32>
    %32 = math.tanh %31 : vector<1x32xf32>
    %33 = vector.extract_strided_slice %18 {offsets = [0, 96], sizes = [1, 32], strides = [1, 1]} : vector<1x128xf32> to vector<1x32xf32>
    %34 = arith.negf %33 : vector<1x32xf32>
    %35 = math.exp %34 : vector<1x32xf32>
    %cst_21 = arith.constant 1.000000e+00 : f32
    %36 = vector.broadcast %cst_21 : f32 to vector<1x32xf32>
    %37 = arith.addf %36, %35 : vector<1x32xf32>
    %38 = arith.divf %36, %37 : vector<1x32xf32>
    %39 = arith.mulf %30, %4 : vector<1x32xf32>
    %40 = arith.mulf %24, %32 : vector<1x32xf32>
    %41 = arith.addf %39, %40 : vector<1x32xf32>
    %42 = math.tanh %41 : vector<1x32xf32>
    %43 = arith.mulf %38, %42 : vector<1x32xf32>
    %cst_22 = arith.constant dense<0.000000e+00> : vector<1x32xf32>
    %44 = tpu.matmul %43, %13, %cst_22 {dimension_numbers = #tpu.dot_dimension_numbers<[1], [0], [0], [1], [0, 0, 1, 1], [], []>} : vector<1x32xf32>, vector<32x32xf32>, vector<1x32xf32> -> vector<1x32xf32>
    %45 = vector.broadcast %44 : vector<1x32xf32> to vector<8x32xf32>
    %46 = arith.addf %15, %45 : vector<8x32xf32>
    %47 = math.tanh %46 : vector<8x32xf32>
    %48 = vector.broadcast %7 : vector<1x32xf32> to vector<8x32xf32>
    %49 = arith.mulf %47, %48 : vector<8x32xf32>
    %cst_23 = arith.constant dense<0.000000e+00> : vector<8xf32>
    %50 = vector.multi_reduction <add>, %49, %cst_23 [1] : vector<8x32xf32> to vector<8xf32>
    %51 = vector.shape_cast %50 : vector<8xf32> to vector<8x1xf32>
    %cst_24 = arith.constant dense<0xFF800000> : vector<1xf32>
    %52 = vector.multi_reduction <maximumf>, %51, %cst_24 [0] : vector<8x1xf32> to vector<1xf32>
    %53 = vector.shape_cast %52 : vector<1xf32> to vector<1x1xf32>
    %54 = vector.broadcast %53 : vector<1x1xf32> to vector<8x1xf32>
    %55 = arith.subf %51, %54 : vector<8x1xf32>
    %56 = math.exp %55 : vector<8x1xf32>
    %cst_25 = arith.constant dense<0.000000e+00> : vector<1xf32>
    %57 = vector.multi_reduction <add>, %56, %cst_25 [0] : vector<8x1xf32> to vector<1xf32>
    %58 = vector.shape_cast %57 : vector<1xf32> to vector<1x1xf32>
    %59 = tpu.reciprocal %58 {approx = true} : vector<1x1xf32> -> vector<1x1xf32>
    %60 = vector.broadcast %59 : vector<1x1xf32> to vector<8x1xf32>
    %61 = arith.mulf %56, %60 : vector<8x1xf32>
    %62 = vector.broadcast %61 : vector<8x1xf32> to vector<8x32xf32>
    %63 = arith.mulf %62, %15 : vector<8x32xf32>
    %cst_26 = arith.constant dense<0.000000e+00> : vector<32xf32>
    %64 = vector.multi_reduction <add>, %63, %cst_26 [0] : vector<8x32xf32> to vector<32xf32>
    %65 = vector.shape_cast %64 : vector<32xf32> to vector<1x32xf32>
    %cst_27 = arith.constant dense<0.000000e+00> : vector<1x32xf32>
    %66 = tpu.matmul %65, %13, %cst_27 {dimension_numbers = #tpu.dot_dimension_numbers<[1], [0], [0], [1], [0, 0, 1, 1], [], []>} : vector<1x32xf32>, vector<32x32xf32>, vector<1x32xf32> -> vector<1x32xf32>
    %67 = vector.broadcast %66 : vector<1x32xf32> to vector<8x32xf32>
    %68 = arith.addf %15, %67 : vector<8x32xf32>
    %69 = math.tanh %68 : vector<8x32xf32>
    %70 = vector.broadcast %7 : vector<1x32xf32> to vector<8x32xf32>
    %71 = arith.mulf %69, %70 : vector<8x32xf32>
    %cst_28 = arith.constant dense<0.000000e+00> : vector<8xf32>
    %72 = vector.multi_reduction <add>, %71, %cst_28 [1] : vector<8x32xf32> to vector<8xf32>
    %73 = vector.shape_cast %72 : vector<8xf32> to vector<8x1xf32>
    %cst_29 = arith.constant dense<0xFF800000> : vector<1xf32>
    %74 = vector.multi_reduction <maximumf>, %73, %cst_29 [0] : vector<8x1xf32> to vector<1xf32>
    %75 = vector.shape_cast %74 : vector<1xf32> to vector<1x1xf32>
    %76 = vector.broadcast %75 : vector<1x1xf32> to vector<8x1xf32>
    %77 = arith.subf %73, %76 : vector<8x1xf32>
    %78 = math.exp %77 : vector<8x1xf32>
    %cst_30 = arith.constant dense<0.000000e+00> : vector<1xf32>
    %79 = vector.multi_reduction <add>, %78, %cst_30 [0] : vector<8x1xf32> to vector<1xf32>
    %80 = vector.shape_cast %79 : vector<1xf32> to vector<1x1xf32>
    %81 = tpu.reciprocal %80 {approx = true} : vector<1x1xf32> -> vector<1x1xf32>
    %82 = vector.broadcast %81 : vector<1x1xf32> to vector<8x1xf32>
    %83 = arith.mulf %78, %82 : vector<8x1xf32>
    %84 = vector.broadcast %83 : vector<8x1xf32> to vector<8x32xf32>
    %85 = arith.mulf %84, %15 : vector<8x32xf32>
    %cst_31 = arith.constant dense<0.000000e+00> : vector<32xf32>
    %86 = vector.multi_reduction <add>, %85, %cst_31 [0] : vector<8x32xf32> to vector<32xf32>
    %87 = vector.shape_cast %86 : vector<32xf32> to vector<1x32xf32>
    %cst_32 = arith.constant dense<0.000000e+00> : vector<1x32xf32>
    %88 = tpu.matmul %87, %12, %cst_32 {dimension_numbers = #tpu.dot_dimension_numbers<[1], [0], [0], [1], [0, 0, 1, 1], [], []>} : vector<1x32xf32>, vector<32x32xf32>, vector<1x32xf32> -> vector<1x32xf32>
    %89 = vector.broadcast %88 : vector<1x32xf32> to vector<8x32xf32>
    %90 = arith.addf %14, %89 : vector<8x32xf32>
    %91 = math.tanh %90 : vector<8x32xf32>
    %92 = vector.broadcast %6 : vector<1x32xf32> to vector<8x32xf32>
    %93 = arith.mulf %91, %92 : vector<8x32xf32>
    %cst_33 = arith.constant dense<0.000000e+00> : vector<8xf32>
    %94 = vector.multi_reduction <add>, %93, %cst_33 [1] : vector<8x32xf32> to vector<8xf32>
    %95 = vector.shape_cast %94 : vector<8xf32> to vector<8x1xf32>
    %cst_34 = arith.constant dense<0xFF800000> : vector<1xf32>
    %96 = vector.multi_reduction <maximumf>, %95, %cst_34 [0] : vector<8x1xf32> to vector<1xf32>
    %97 = vector.shape_cast %96 : vector<1xf32> to vector<1x1xf32>
    %98 = vector.broadcast %97 : vector<1x1xf32> to vector<8x1xf32>
    %99 = arith.subf %95, %98 : vector<8x1xf32>
    %100 = math.exp %99 : vector<8x1xf32>
    %cst_35 = arith.constant dense<0.000000e+00> : vector<1xf32>
    %101 = vector.multi_reduction <add>, %100, %cst_35 [0] : vector<8x1xf32> to vector<1xf32>
    %102 = vector.shape_cast %101 : vector<1xf32> to vector<1x1xf32>
    %103 = tpu.reciprocal %102 {approx = true} : vector<1x1xf32> -> vector<1x1xf32>
    %104 = vector.broadcast %103 : vector<1x1xf32> to vector<8x1xf32>
    %105 = arith.mulf %100, %104 : vector<8x1xf32>
    %106 = vector.broadcast %105 : vector<8x1xf32> to vector<8x32xf32>
    %107 = arith.mulf %106, %0 : vector<8x32xf32>
    %cst_36 = arith.constant dense<0.000000e+00> : vector<32xf32>
    %108 = vector.multi_reduction <add>, %107, %cst_36 [0] : vector<8x32xf32> to vector<32xf32>
    %109 = vector.shape_cast %108 : vector<32xf32> to vector<1x32xf32>
    %110 = arith.mulf %109, %8 : vector<1x32xf32>
    %cst_37 = arith.constant dense<0.000000e+00> : vector<1xf32>
    %111 = vector.multi_reduction <add>, %110, %cst_37 [1] : vector<1x32xf32> to vector<1xf32>
    %112 = vector.shape_cast %111 : vector<1xf32> to vector<1x1xf32>
    %113 = arith.addf %112, %9 : vector<1x1xf32>
    %114 = arith.index_cast %c0_i32 : i32 to index
    %c0_38 = arith.constant 0 : index
    %115 = vector.load %arg5[%114, %c0_38] : memref<3x1xf32, #tpu.memory_space<vmem>>, vector<1x1xf32>
    tpu.vector_store %arg5[%114, %c0_38], %113 {strides = array<i32>} : memref<3x1xf32, #tpu.memory_space<vmem>>, vector<1x1xf32>,
    %c1_i32 = arith.constant 1 : i32
    %116 = tpu.concatenate %109, %43 in 1 : vector<1x32xf32>, vector<1x32xf32> -> vector<1x64xf32>
    %cst_39 = arith.constant dense<0.000000e+00> : vector<1x128xf32>
    %117 = tpu.matmul %116, %1, %cst_39 {dimension_numbers = #tpu.dot_dimension_numbers<[1], [0], [0], [1], [0, 0, 1, 1], [], []>} : vector<1x64xf32>, vector<64x128xf32>, vector<1x128xf32> -> vector<1x128xf32>
    %118 = arith.addf %117, %2 : vector<1x128xf32>
    %119 = vector.extract_strided_slice %118 {offsets = [0, 0], sizes = [1, 32], strides = [1, 1]} : vector<1x128xf32> to vector<1x32xf32>
    %120 = arith.negf %119 : vector<1x32xf32>
    %121 = math.exp %120 : vector<1x32xf32>
    %cst_40 = arith.constant 1.000000e+00 : f32
    %122 = vector.broadcast %cst_40 : f32 to vector<1x32xf32>
    %123 = arith.addf %122, %121 : vector<1x32xf32>
    %124 = arith.divf %122, %123 : vector<1x32xf32>
    %125 = vector.extract_strided_slice %118 {offsets = [0, 32], sizes = [1, 32], strides = [1, 1]} : vector<1x128xf32> to vector<1x32xf32>
    %126 = arith.negf %125 : vector<1x32xf32>
    %127 = math.exp %126 : vector<1x32xf32>
    %cst_41 = arith.constant 1.000000e+00 : f32
    %128 = vector.broadcast %cst_41 : f32 to vector<1x32xf32>
    %129 = arith.addf %128, %127 : vector<1x32xf32>
    %130 = arith.divf %128, %129 : vector<1x32xf32>
    %131 = vector.extract_strided_slice %118 {offsets = [0, 64], sizes = [1, 32], strides = [1, 1]} : vector<1x128xf32> to vector<1x32xf32>
    %132 = math.tanh %131 : vector<1x32xf32>
    %133 = vector.extract_strided_slice %118 {offsets = [0, 96], sizes = [1, 32], strides = [1, 1]} : vector<1x128xf32> to vector<1x32xf32>
    %134 = arith.negf %133 : vector<1x32xf32>
    %135 = math.exp %134 : vector<1x32xf32>
    %cst_42 = arith.constant 1.000000e+00 : f32
    %136 = vector.broadcast %cst_42 : f32 to vector<1x32xf32>
    %137 = arith.addf %136, %135 : vector<1x32xf32>
    %138 = arith.divf %136, %137 : vector<1x32xf32>
    %139 = arith.mulf %130, %41 : vector<1x32xf32>
    %140 = arith.mulf %124, %132 : vector<1x32xf32>
    %141 = arith.addf %139, %140 : vector<1x32xf32>
    %142 = math.tanh %141 : vector<1x32xf32>
    %143 = arith.mulf %138, %142 : vector<1x32xf32>
    %cst_43 = arith.constant dense<0.000000e+00> : vector<1x32xf32>
    %144 = tpu.matmul %143, %13, %cst_43 {dimension_numbers = #tpu.dot_dimension_numbers<[1], [0], [0], [1], [0, 0, 1, 1], [], []>} : vector<1x32xf32>, vector<32x32xf32>, vector<1x32xf32> -> vector<1x32xf32>
    %145 = vector.broadcast %144 : vector<1x32xf32> to vector<8x32xf32>
    %146 = arith.addf %15, %145 : vector<8x32xf32>
    %147 = math.tanh %146 : vector<8x32xf32>
    %148 = vector.broadcast %7 : vector<1x32xf32> to vector<8x32xf32>
    %149 = arith.mulf %147, %148 : vector<8x32xf32>
    %cst_44 = arith.constant dense<0.000000e+00> : vector<8xf32>
    %150 = vector.multi_reduction <add>, %149, %cst_44 [1] : vector<8x32xf32> to vector<8xf32>
    %151 = vector.shape_cast %150 : vector<8xf32> to vector<8x1xf32>
    %cst_45 = arith.constant dense<0xFF800000> : vector<1xf32>
    %152 = vector.multi_reduction <maximumf>, %151, %cst_45 [0] : vector<8x1xf32> to vector<1xf32>
    %153 = vector.shape_cast %152 : vector<1xf32> to vector<1x1xf32>
    %154 = vector.broadcast %153 : vector<1x1xf32> to vector<8x1xf32>
    %155 = arith.subf %151, %154 : vector<8x1xf32>
    %156 = math.exp %155 : vector<8x1xf32>
    %cst_46 = arith.constant dense<0.000000e+00> : vector<1xf32>
    %157 = vector.multi_reduction <add>, %156, %cst_46 [0] : vector<8x1xf32> to vector<1xf32>
    %158 = vector.shape_cast %157 : vector<1xf32> to vector<1x1xf32>
    %159 = tpu.reciprocal %158 {approx = true} : vector<1x1xf32> -> vector<1x1xf32>
    %160 = vector.broadcast %159 : vector<1x1xf32> to vector<8x1xf32>
    %161 = arith.mulf %156, %160 : vector<8x1xf32>
    %162 = vector.broadcast %161 : vector<8x1xf32> to vector<8x32xf32>
    %163 = arith.mulf %162, %15 : vector<8x32xf32>
    %cst_47 = arith.constant dense<0.000000e+00> : vector<32xf32>
    %164 = vector.multi_reduction <add>, %163, %cst_47 [0] : vector<8x32xf32> to vector<32xf32>
    %165 = vector.shape_cast %164 : vector<32xf32> to vector<1x32xf32>
    %cst_48 = arith.constant dense<0.000000e+00> : vector<1x32xf32>
    %166 = tpu.matmul %165, %13, %cst_48 {dimension_numbers = #tpu.dot_dimension_numbers<[1], [0], [0], [1], [0, 0, 1, 1], [], []>} : vector<1x32xf32>, vector<32x32xf32>, vector<1x32xf32> -> vector<1x32xf32>
    %167 = vector.broadcast %166 : vector<1x32xf32> to vector<8x32xf32>
    %168 = arith.addf %15, %167 : vector<8x32xf32>
    %169 = math.tanh %168 : vector<8x32xf32>
    %170 = vector.broadcast %7 : vector<1x32xf32> to vector<8x32xf32>
    %171 = arith.mulf %169, %170 : vector<8x32xf32>
    %cst_49 = arith.constant dense<0.000000e+00> : vector<8xf32>
    %172 = vector.multi_reduction <add>, %171, %cst_49 [1] : vector<8x32xf32> to vector<8xf32>
    %173 = vector.shape_cast %172 : vector<8xf32> to vector<8x1xf32>
    %cst_50 = arith.constant dense<0xFF800000> : vector<1xf32>
    %174 = vector.multi_reduction <maximumf>, %173, %cst_50 [0] : vector<8x1xf32> to vector<1xf32>
    %175 = vector.shape_cast %174 : vector<1xf32> to vector<1x1xf32>
    %176 = vector.broadcast %175 : vector<1x1xf32> to vector<8x1xf32>
    %177 = arith.subf %173, %176 : vector<8x1xf32>
    %178 = math.exp %177 : vector<8x1xf32>
    %cst_51 = arith.constant dense<0.000000e+00> : vector<1xf32>
    %179 = vector.multi_reduction <add>, %178, %cst_51 [0] : vector<8x1xf32> to vector<1xf32>
    %180 = vector.shape_cast %179 : vector<1xf32> to vector<1x1xf32>
    %181 = tpu.reciprocal %180 {approx = true} : vector<1x1xf32> -> vector<1x1xf32>
    %182 = vector.broadcast %181 : vector<1x1xf32> to vector<8x1xf32>
    %183 = arith.mulf %178, %182 : vector<8x1xf32>
    %184 = vector.broadcast %183 : vector<8x1xf32> to vector<8x32xf32>
    %185 = arith.mulf %184, %15 : vector<8x32xf32>
    %cst_52 = arith.constant dense<0.000000e+00> : vector<32xf32>
    %186 = vector.multi_reduction <add>, %185, %cst_52 [0] : vector<8x32xf32> to vector<32xf32>
    %187 = vector.shape_cast %186 : vector<32xf32> to vector<1x32xf32>
    %cst_53 = arith.constant dense<0.000000e+00> : vector<1x32xf32>
    %188 = tpu.matmul %187, %12, %cst_53 {dimension_numbers = #tpu.dot_dimension_numbers<[1], [0], [0], [1], [0, 0, 1, 1], [], []>} : vector<1x32xf32>, vector<32x32xf32>, vector<1x32xf32> -> vector<1x32xf32>
    %189 = vector.broadcast %188 : vector<1x32xf32> to vector<8x32xf32>
    %190 = arith.addf %14, %189 : vector<8x32xf32>
    %191 = math.tanh %190 : vector<8x32xf32>
    %192 = vector.broadcast %6 : vector<1x32xf32> to vector<8x32xf32>
    %193 = arith.mulf %191, %192 : vector<8x32xf32>
    %cst_54 = arith.constant dense<0.000000e+00> : vector<8xf32>
    %194 = vector.multi_reduction <add>, %193, %cst_54 [1] : vector<8x32xf32> to vector<8xf32>
    %195 = vector.shape_cast %194 : vector<8xf32> to vector<8x1xf32>
    %cst_55 = arith.constant dense<0xFF800000> : vector<1xf32>
    %196 = vector.multi_reduction <maximumf>, %195, %cst_55 [0] : vector<8x1xf32> to vector<1xf32>
    %197 = vector.shape_cast %196 : vector<1xf32> to vector<1x1xf32>
    %198 = vector.broadcast %197 : vector<1x1xf32> to vector<8x1xf32>
    %199 = arith.subf %195, %198 : vector<8x1xf32>
    %200 = math.exp %199 : vector<8x1xf32>
    %cst_56 = arith.constant dense<0.000000e+00> : vector<1xf32>
    %201 = vector.multi_reduction <add>, %200, %cst_56 [0] : vector<8x1xf32> to vector<1xf32>
    %202 = vector.shape_cast %201 : vector<1xf32> to vector<1x1xf32>
    %203 = tpu.reciprocal %202 {approx = true} : vector<1x1xf32> -> vector<1x1xf32>
    %204 = vector.broadcast %203 : vector<1x1xf32> to vector<8x1xf32>
    %205 = arith.mulf %200, %204 : vector<8x1xf32>
    %206 = vector.broadcast %205 : vector<8x1xf32> to vector<8x32xf32>
    %207 = arith.mulf %206, %0 : vector<8x32xf32>
    %cst_57 = arith.constant dense<0.000000e+00> : vector<32xf32>
    %208 = vector.multi_reduction <add>, %207, %cst_57 [0] : vector<8x32xf32> to vector<32xf32>
    %209 = vector.shape_cast %208 : vector<32xf32> to vector<1x32xf32>
    %210 = arith.mulf %209, %8 : vector<1x32xf32>
    %cst_58 = arith.constant dense<0.000000e+00> : vector<1xf32>
    %211 = vector.multi_reduction <add>, %210, %cst_58 [1] : vector<1x32xf32> to vector<1xf32>
    %212 = vector.shape_cast %211 : vector<1xf32> to vector<1x1xf32>
    %213 = arith.addf %212, %9 : vector<1x1xf32>
    %214 = arith.index_cast %c1_i32 : i32 to index
    %c0_59 = arith.constant 0 : index
    %215 = vector.load %arg5[%214, %c0_59] : memref<3x1xf32, #tpu.memory_space<vmem>>, vector<1x1xf32>
    tpu.vector_store %arg5[%214, %c0_59], %213 {strides = array<i32>} : memref<3x1xf32, #tpu.memory_space<vmem>>, vector<1x1xf32>,
    %c2_i32 = arith.constant 2 : i32
    %216 = tpu.concatenate %209, %143 in 1 : vector<1x32xf32>, vector<1x32xf32> -> vector<1x64xf32>
    %cst_60 = arith.constant dense<0.000000e+00> : vector<1x128xf32>
    %217 = tpu.matmul %216, %1, %cst_60 {dimension_numbers = #tpu.dot_dimension_numbers<[1], [0], [0], [1], [0, 0, 1, 1], [], []>} : vector<1x64xf32>, vector<64x128xf32>, vector<1x128xf32> -> vector<1x128xf32>
    %218 = arith.addf %217, %2 : vector<1x128xf32>
    %219 = vector.extract_strided_slice %218 {offsets = [0, 0], sizes = [1, 32], strides = [1, 1]} : vector<1x128xf32> to vector<1x32xf32>
    %220 = arith.negf %219 : vector<1x32xf32>
    %221 = math.exp %220 : vector<1x32xf32>
    %cst_61 = arith.constant 1.000000e+00 : f32
    %222 = vector.broadcast %cst_61 : f32 to vector<1x32xf32>
    %223 = arith.addf %222, %221 : vector<1x32xf32>
    %224 = arith.divf %222, %223 : vector<1x32xf32>
    %225 = vector.extract_strided_slice %218 {offsets = [0, 32], sizes = [1, 32], strides = [1, 1]} : vector<1x128xf32> to vector<1x32xf32>
    %226 = arith.negf %225 : vector<1x32xf32>
    %227 = math.exp %226 : vector<1x32xf32>
    %cst_62 = arith.constant 1.000000e+00 : f32
    %228 = vector.broadcast %cst_62 : f32 to vector<1x32xf32>
    %229 = arith.addf %228, %227 : vector<1x32xf32>
    %230 = arith.divf %228, %229 : vector<1x32xf32>
    %231 = vector.extract_strided_slice %218 {offsets = [0, 64], sizes = [1, 32], strides = [1, 1]} : vector<1x128xf32> to vector<1x32xf32>
    %232 = math.tanh %231 : vector<1x32xf32>
    %233 = vector.extract_strided_slice %218 {offsets = [0, 96], sizes = [1, 32], strides = [1, 1]} : vector<1x128xf32> to vector<1x32xf32>
    %234 = arith.negf %233 : vector<1x32xf32>
    %235 = math.exp %234 : vector<1x32xf32>
    %cst_63 = arith.constant 1.000000e+00 : f32
    %236 = vector.broadcast %cst_63 : f32 to vector<1x32xf32>
    %237 = arith.addf %236, %235 : vector<1x32xf32>
    %238 = arith.divf %236, %237 : vector<1x32xf32>
    %239 = arith.mulf %230, %141 : vector<1x32xf32>
    %240 = arith.mulf %224, %232 : vector<1x32xf32>
    %241 = arith.addf %239, %240 : vector<1x32xf32>
    %242 = math.tanh %241 : vector<1x32xf32>
    %243 = arith.mulf %238, %242 : vector<1x32xf32>
    %cst_64 = arith.constant dense<0.000000e+00> : vector<1x32xf32>
    %244 = tpu.matmul %243, %13, %cst_64 {dimension_numbers = #tpu.dot_dimension_numbers<[1], [0], [0], [1], [0, 0, 1, 1], [], []>} : vector<1x32xf32>, vector<32x32xf32>, vector<1x32xf32> -> vector<1x32xf32>
    %245 = vector.broadcast %244 : vector<1x32xf32> to vector<8x32xf32>
    %246 = arith.addf %15, %245 : vector<8x32xf32>
    %247 = math.tanh %246 : vector<8x32xf32>
    %248 = vector.broadcast %7 : vector<1x32xf32> to vector<8x32xf32>
    %249 = arith.mulf %247, %248 : vector<8x32xf32>
    %cst_65 = arith.constant dense<0.000000e+00> : vector<8xf32>
    %250 = vector.multi_reduction <add>, %249, %cst_65 [1] : vector<8x32xf32> to vector<8xf32>
    %251 = vector.shape_cast %250 : vector<8xf32> to vector<8x1xf32>
    %cst_66 = arith.constant dense<0xFF800000> : vector<1xf32>
    %252 = vector.multi_reduction <maximumf>, %251, %cst_66 [0] : vector<8x1xf32> to vector<1xf32>
    %253 = vector.shape_cast %252 : vector<1xf32> to vector<1x1xf32>
    %254 = vector.broadcast %253 : vector<1x1xf32> to vector<8x1xf32>
    %255 = arith.subf %251, %254 : vector<8x1xf32>
    %256 = math.exp %255 : vector<8x1xf32>
    %cst_67 = arith.constant dense<0.000000e+00> : vector<1xf32>
    %257 = vector.multi_reduction <add>, %256, %cst_67 [0] : vector<8x1xf32> to vector<1xf32>
    %258 = vector.shape_cast %257 : vector<1xf32> to vector<1x1xf32>
    %259 = tpu.reciprocal %258 {approx = true} : vector<1x1xf32> -> vector<1x1xf32>
    %260 = vector.broadcast %259 : vector<1x1xf32> to vector<8x1xf32>
    %261 = arith.mulf %256, %260 : vector<8x1xf32>
    %262 = vector.broadcast %261 : vector<8x1xf32> to vector<8x32xf32>
    %263 = arith.mulf %262, %15 : vector<8x32xf32>
    %cst_68 = arith.constant dense<0.000000e+00> : vector<32xf32>
    %264 = vector.multi_reduction <add>, %263, %cst_68 [0] : vector<8x32xf32> to vector<32xf32>
    %265 = vector.shape_cast %264 : vector<32xf32> to vector<1x32xf32>
    %cst_69 = arith.constant dense<0.000000e+00> : vector<1x32xf32>
    %266 = tpu.matmul %265, %13, %cst_69 {dimension_numbers = #tpu.dot_dimension_numbers<[1], [0], [0], [1], [0, 0, 1, 1], [], []>} : vector<1x32xf32>, vector<32x32xf32>, vector<1x32xf32> -> vector<1x32xf32>
    %267 = vector.broadcast %266 : vector<1x32xf32> to vector<8x32xf32>
    %268 = arith.addf %15, %267 : vector<8x32xf32>
    %269 = math.tanh %268 : vector<8x32xf32>
    %270 = vector.broadcast %7 : vector<1x32xf32> to vector<8x32xf32>
    %271 = arith.mulf %269, %270 : vector<8x32xf32>
    %cst_70 = arith.constant dense<0.000000e+00> : vector<8xf32>
    %272 = vector.multi_reduction <add>, %271, %cst_70 [1] : vector<8x32xf32> to vector<8xf32>
    %273 = vector.shape_cast %272 : vector<8xf32> to vector<8x1xf32>
    %cst_71 = arith.constant dense<0xFF800000> : vector<1xf32>
    %274 = vector.multi_reduction <maximumf>, %273, %cst_71 [0] : vector<8x1xf32> to vector<1xf32>
    %275 = vector.shape_cast %274 : vector<1xf32> to vector<1x1xf32>
    %276 = vector.broadcast %275 : vector<1x1xf32> to vector<8x1xf32>
    %277 = arith.subf %273, %276 : vector<8x1xf32>
    %278 = math.exp %277 : vector<8x1xf32>
    %cst_72 = arith.constant dense<0.000000e+00> : vector<1xf32>
    %279 = vector.multi_reduction <add>, %278, %cst_72 [0] : vector<8x1xf32> to vector<1xf32>
    %280 = vector.shape_cast %279 : vector<1xf32> to vector<1x1xf32>
    %281 = tpu.reciprocal %280 {approx = true} : vector<1x1xf32> -> vector<1x1xf32>
    %282 = vector.broadcast %281 : vector<1x1xf32> to vector<8x1xf32>
    %283 = arith.mulf %278, %282 : vector<8x1xf32>
    %284 = vector.broadcast %283 : vector<8x1xf32> to vector<8x32xf32>
    %285 = arith.mulf %284, %15 : vector<8x32xf32>
    %cst_73 = arith.constant dense<0.000000e+00> : vector<32xf32>
    %286 = vector.multi_reduction <add>, %285, %cst_73 [0] : vector<8x32xf32> to vector<32xf32>
    %287 = vector.shape_cast %286 : vector<32xf32> to vector<1x32xf32>
    %cst_74 = arith.constant dense<0.000000e+00> : vector<1x32xf32>
    %288 = tpu.matmul %287, %12, %cst_74 {dimension_numbers = #tpu.dot_dimension_numbers<[1], [0], [0], [1], [0, 0, 1, 1], [], []>} : vector<1x32xf32>, vector<32x32xf32>, vector<1x32xf32> -> vector<1x32xf32>
    %289 = vector.broadcast %288 : vector<1x32xf32> to vector<8x32xf32>
    %290 = arith.addf %14, %289 : vector<8x32xf32>
    %291 = math.tanh %290 : vector<8x32xf32>
    %292 = vector.broadcast %6 : vector<1x32xf32> to vector<8x32xf32>
    %293 = arith.mulf %291, %292 : vector<8x32xf32>
    %cst_75 = arith.constant dense<0.000000e+00> : vector<8xf32>
    %294 = vector.multi_reduction <add>, %293, %cst_75 [1] : vector<8x32xf32> to vector<8xf32>
    %295 = vector.shape_cast %294 : vector<8xf32> to vector<8x1xf32>
    %cst_76 = arith.constant dense<0xFF800000> : vector<1xf32>
    %296 = vector.multi_reduction <maximumf>, %295, %cst_76 [0] : vector<8x1xf32> to vector<1xf32>
    %297 = vector.shape_cast %296 : vector<1xf32> to vector<1x1xf32>
    %298 = vector.broadcast %297 : vector<1x1xf32> to vector<8x1xf32>
    %299 = arith.subf %295, %298 : vector<8x1xf32>
    %300 = math.exp %299 : vector<8x1xf32>
    %cst_77 = arith.constant dense<0.000000e+00> : vector<1xf32>
    %301 = vector.multi_reduction <add>, %300, %cst_77 [0] : vector<8x1xf32> to vector<1xf32>
    %302 = vector.shape_cast %301 : vector<1xf32> to vector<1x1xf32>
    %303 = tpu.reciprocal %302 {approx = true} : vector<1x1xf32> -> vector<1x1xf32>
    %304 = vector.broadcast %303 : vector<1x1xf32> to vector<8x1xf32>
    %305 = arith.mulf %300, %304 : vector<8x1xf32>
    %306 = vector.broadcast %305 : vector<8x1xf32> to vector<8x32xf32>
    %307 = arith.mulf %306, %0 : vector<8x32xf32>
    %cst_78 = arith.constant dense<0.000000e+00> : vector<32xf32>
    %308 = vector.multi_reduction <add>, %307, %cst_78 [0] : vector<8x32xf32> to vector<32xf32>
    %309 = vector.shape_cast %308 : vector<32xf32> to vector<1x32xf32>
    %310 = arith.mulf %309, %8 : vector<1x32xf32>
    %cst_79 = arith.constant dense<0.000000e+00> : vector<1xf32>
    %311 = vector.multi_reduction <add>, %310, %cst_79 [1] : vector<1x32xf32> to vector<1xf32>
    %312 = vector.shape_cast %311 : vector<1xf32> to vector<1x1xf32>
    %313 = arith.addf %312, %9 : vector<1x1xf32>
    %314 = arith.index_cast %c2_i32 : i32 to index
    %c0_80 = arith.constant 0 : index
    %315 = vector.load %arg5[%314, %c0_80] : memref<3x1xf32, #tpu.memory_space<vmem>>, vector<1x1xf32>
    tpu.vector_store %arg5[%314, %c0_80], %313 {strides = array<i32>} : memref<3x1xf32, #tpu.memory_space<vmem>>, vector<1x1xf32>,
    %c3_i32 = arith.constant 3 : i32
    return
  }
  func.func @transform_0(%arg0: i32) -> (i32, i32) {
    %c0_i32 = arith.constant 0 : i32
    %c0_i32_0 = arith.constant 0 : i32
    %c0_i32_1 = arith.constant 0 : i32
    return %c0_i32, %c0_i32_0 : i32, i32
  }
  func.func @transform_1(%arg0: i32) -> (i32, i32) {
    %c0_i32 = arith.constant 0 : i32
    %c0_i32_0 = arith.constant 0 : i32
    %c0_i32_1 = arith.constant 0 : i32
    return %c0_i32, %c0_i32_0 : i32, i32
  }
  func.func @transform_2(%arg0: i32) -> (i32, i32) {
    %c0_i32 = arith.constant 0 : i32
    %c0_i32_0 = arith.constant 0 : i32
    %c0_i32_1 = arith.constant 0 : i32
    return %c0_i32, %c0_i32_0 : i32, i32
  }
  func.func @transform_3(%arg0: i32) -> (i32, i32) {
    %c0_i32 = arith.constant 0 : i32
    %c0_i32_0 = arith.constant 0 : i32
    %c0_i32_1 = arith.constant 0 : i32
    return %c0_i32, %c0_i32_0 : i32, i32
  }
  func.func @transform_4(%arg0: i32) -> (i32, i32) {
    %c0_i32 = arith.constant 0 : i32
    %c0_i32_0 = arith.constant 0 : i32
    %c0_i32_1 = arith.constant 0 : i32
    return %c0_i32, %c0_i32_0 : i32, i32
  }
}

</mosaic_0001>

<bundles_post_ra>
// kernel: tpu_custom_call.1
= control target key start
LH: loop header
LB: loop body
LE: loop exit
PB: predicated region body
PF: predicated region fallthrough
CT: control target
= control target key end

     0   :  { %v1978_v1 = vmov 0.0|0.0   ;;  %vm1979_vm0 = vmmov 0   ;;  %v1980_v4 = vmov 0.0   ;;  %s1981_s21 = smov 32   ;;  %vm50_vm1 = vcmask 261120   ;;  %s1982_s24 = smov 64   ;;  %s2372_s2 = inlined_call_operand.vmem [shape: f32[8,128], index: 2, kind: input, shape index: {}]   ;;  %s2373_s3 = inlined_call_operand.vmem [shape: f32[128,32], index: 3, kind: input, shape index: {}]   ;;  %s2374_s1 = inlined_call_operand.vmem [shape: f32[64,128], index: 1, kind: input, shape index: {}]   ;;  %s2375_s0 = inlined_call_operand.vmem [shape: f32[8,32], index: 0, kind: input, shape index: {}]   ;;  %s2376_s4 = inlined_call_operand.vmem [shape: f32[3,1], index: 4, kind: output, shape index: {}]  }
   0x1   :  { %v27_v0 = vld [vmem:[%s2372_s2 + $0x1] sm:$0x1]  ;;  %1792 = vmatprep.subr.bf16.mxu0 %v1978_v1  ;;  %v35_v3 = vld [vmem:[%s2373_s3 + $0x8] sm:$0xff]  ;;  %1622 = vmatprep.mubr.msk.f32.mxu0 %vm1979_vm0, %v1980_v4  ;;  %v36_v6 = vld [vmem:[%s2373_s3 + $0x10] sm:$0xff]  ;;  %vm199_vm2 = vcmask 523264   ;;  %v376_v61 = vlaneseq  ;;  %vm636_vm3 = vcmask 253952  }
   0x2   :  { %v34_v2 = vld [vmem:[%s2373_s3] sm:$0xff]  ;;  %195 = vrot.lane.b32.xlu0 %v27_v0, %s1981_s21  ;;  %v37_v7 = vld [vmem:[%s2373_s3 + $0x18] sm:$0xff]  ;;  %1798 = vmatprep.subr.bf16.mxu1 %v1978_v1  ;;  %v19_v10 = vld [vmem:[%s2374_s1 + $0x8] sm:$0xff]  ;;  %vm641_vm4 = vcmask 0  }
   0x3   :  { %v1793_v5 = vpack.c.bf16 %v35_v3, %v34_v2  ;;  %1633 = vmatprep.mubr.msk.f32.mxu1 %vm1979_vm0, %v1980_v4  ;;  %v1796_v8 = vpack.c.bf16 %v37_v7, %v36_v6  ;;  %v18_v9 = vld [vmem:[%s2374_s1] sm:$0xff]  ;;  %v20_v14 = vld [vmem:[%s2374_s1 + $0x10] sm:$0xff]  ;;  %v21_v15 = vld [vmem:[%s2374_s1 + $0x18] sm:$0xff]  ;;  %v377_v62 = vshrl.u32 %v376_v61, 7 }
   0x4   :  { %v28_v11 = vld [vmem:[%s2372_s2 + $0x2] sm:$0x1]  ;;  %v2046_v13 = vpack.c.bf16 %v19_v10, %v18_v9  ;;  %v2058_v16 = vpack.c.bf16 %v21_v15, %v20_v14  ;;  %v23_v18 = vld [vmem:[%s2374_s1 + $0x28] sm:$0xff]  ;;  %v24_v20 = vld [vmem:[%s2374_s1 + $0x30] sm:$0xff] }
   0x5   :  { %1794 = vmatpush3.bf16.msra.mxu0 %v1793_v5  ;;  %281 = vrot.lane.b32.xlu1 %v28_v11, %s1981_s21  ;;  %v2044_v12 = vld [vmem:[%s2375_s0] sm:$0xff]  ;;  %v25_v21 = vld [vmem:[%s2374_s1 + $0x38] sm:$0xff]  ;;  %v39_v44 = vld [vmem:[%s2373_s3 + $0x28] sm:$0xff]  ;;  %v2157_v63 = vsub.s32 0, %v377_v62 }
   0x6   :  { %1795 = vmatprep.subr.bf16.mxu0 %v1978_v1  ;;  %v22_v17 = vld [vmem:[%s2374_s1 + $0x20] sm:$0xff]  ;;  %v2080_v22 = vpack.c.bf16 %v25_v21, %v24_v20  ;;  %v40_v45 = vld [vmem:[%s2373_s3 + $0x30] sm:$0xff]  ;;  %v41_v47 = vld [vmem:[%s2373_s3 + $0x38] sm:$0xff] }
   0x7   :  { %v2070_v19 = vpack.c.bf16 %v23_v18, %v22_v17  ;;  %v29_v23 = vld [vmem:[%s2372_s2 + $0x3] sm:$0x1]  ;;  %v2097_v28 = vld [vmem:[%s2372_s2] sm:$0x1]  ;;  %v1802_v48 = vpack.c.bf16 %v41_v47, %v40_v45  ;;  %v47_v50 = vld [vmem:[%s2373_s3 + $0x68] sm:$0xff] }
   0x8   :  { %v38_v43 = vld [vmem:[%s2373_s3 + $0x20] sm:$0xff]  ;;  %v48_v52 = vld [vmem:[%s2373_s3 + $0x70] sm:$0xff]  ;;  %v49_v53 = vld [vmem:[%s2373_s3 + $0x78] sm:$0xff] }
   0x9   :  { %1797 = vmatpush3.bf16.msra.mxu0 %v1796_v8  ;;  %v1799_v46 = vpack.c.bf16 %v39_v44, %v38_v43  ;;  %v46_v49 = vld [vmem:[%s2373_s3 + $0x60] sm:$0xff]  ;;  %v2137_v55 = vpack.c.bf16 %v49_v53, %v48_v52  ;;  %v43_v53 = vld [vmem:[%s2373_s3 + $0x48] sm:$0xff] }
   0xa   :  { %1804 = vmatprep.subr.bf16.mxu0 %v1978_v1  ;;  %v2124_v51 = vpack.c.bf16 %v47_v50, %v46_v49  ;;  %v2164_v6 = vld [vmem:[%s2372_s2 + $0x5] ss:$0 sm:$0xff] }
   0xb   :  { %1800 = vmatpush3.bf16.msra.mxu1 %v1799_v46  ;;  %v42_v52 = vld [vmem:[%s2373_s3 + $0x40] sm:$0xff] }
   0xc   :  { %1623 = vmatmul.mubr.msk.f32.vlgmr.msra.gmra.mrb[0].mxu0 %vm50_vm1, %v2044_v12  ;;  %1801 = vmatprep.subr.bf16.mxu1 %v1978_v1 }
   0xd   :  { %1806 = vmatpush3.bf16.msra.mxu0 %v2046_v13  ;;  %1652 = vmatprep.mubr.msk.f32.mxu0 %vm1979_vm0, %v1980_v4 }
   0xe   :  { %1807 = vmatprep.subr.bf16.mxu0 %v1978_v1 }
   0xf   :  { %1803 = vmatpush3.bf16.msra.mxu1 %v1802_v48 }
  0x10   :  { %1816 = vmatprep.subr.bf16.mxu1 %v1978_v1 }
  0x11   :  { %1809 = vmatpush3.bf16.msra.mxu0 %v2058_v16 }
  0x12   :  { %1810 = vmatprep.subr.bf16.mxu0 %v1978_v1  ;;  %1634 = vmatmul.mubr.msk.f32.vlgmr.msra.gmra.mrb[0].mxu1 %vm50_vm1, %v2044_v12 }
  0x13   :  { %1818 = vmatpush3.bf16.msra.mxu1 %v2124_v51  ;;  %1663 = vmatprep.mubr.msk.f32.mxu1 %vm1979_vm0, %v1980_v4 }
  0x14   :  { %1819 = vmatprep.subr.bf16.mxu1 %v1978_v1 }
  0x15   :  { %1812 = vmatpush3.bf16.msra.mxu0 %v2070_v19 }
  0x16   :  { %1813 = vmatprep.subr.bf16.mxu0 %v1978_v1 }
  0x17   :  { %1821 = vmatpush3.bf16.msra.mxu1 %v2137_v55 }
  0x18   :  { %1822 = vmatprep.subr.bf16.mxu1 %v1978_v1 }
  0x19   :  { %1815 = vmatpush3.bf16.msra.mxu0 %v2080_v22 }
  0x1a   :  { %1828 = vmatprep.subr.bf16.mxu0 %v1978_v1 }
  0x74   :  { %v196_v24 = vpop.permute.xlu0 %195 }
  0x75   :  { %v198_v25 = vsel %vm50_vm1, %v29_v23, %v196_v24 }
  0x76   :  { %1653 = vmatmul.mubr.msk.f32.vlgmr.msra.gmra.mrb[2].mxu0 %vm199_vm2, %v198_v25 }
  0x77   :  { %1685 = vmatprep.mubr.msk.f32.mxu0 %vm1979_vm0, %v1980_v4  ;;  %v282_v39 = vpop.permute.xlu1 %281 }
  0xdf   :  { %v2092_v26 = vpop.f32.mrb[0].mxu0 }
  0xe0   :  { %v1624_v27 = vpop.f32.mrb[1].mxu0 }
  0xe5   :  { %v2148_v58 = vpop.f32.mrb[0].mxu1 }
  0xe6   :  { %v1635_v59 = vpop.f32.mrb[1].mxu1 }
  0xe7   :  { %v45_v59 = vld [vmem:[%s2373_s3 + $0x58] sm:$0xff] }
 0x149   :  { %v269_v29 = vpop.f32.mrb[2].mxu0 }
 0x14a   :  { %v270_v30 = vadd.f32 %v269_v29, %v2097_v28  ;;  %v1654_v31 = vpop.f32.mrb[3].mxu0 }
 0x14c   :  { %1899 = vtanh.f32 %v270_v30  ;;  %v1516_v33 = vmul.f32 -1.442695, %v270_v30 }
 0x14e   :  { %1901 = vpow2.f32 %v1516_v33 }
 0x156   :  { %v1900_v32 = vpop.eup %1899 }
 0x157   :  { %286 = vrot.lane.b32.xlu0 %v1900_v32, %s1982_s24 }
 0x158   :  { %v1902_v34 = vpop.eup %1901 }
 0x159   :  { %v276_v35 = vadd.f32 1.0, %v1902_v34 }
 0x15b   :  { %1903 = vrcp.f32 %v276_v35 }
 0x165   :  { %v1904_v36 = vpop.eup %1903 }
 0x166   :  { %v284_v40 = vmul.f32 %v1904_v36, %v282_v39 }
 0x1c9   :  { %v287_v37 = vpop.permute.xlu0 %286 }
 0x1ca   :  { %v289_v38 = vmul.f32 %v1904_v36, %v287_v37 }
 0x1cc   :  { %291 = vrot.lane.b32.xlu1 %v289_v38, %s1981_s21 }
 0x23e   :  { %v292_v41 = vpop.permute.xlu1 %291 }
 0x23f   :  { %v2102_v42 = vadd.f32 %v292_v41, %v284_v40 }
 0x241   :  { %1905 = vtanh.f32 %v2102_v42 }
 0x24b   :  { %v1906_v54 = vpop.eup %1905 }
 0x24c   :  { %297 = vrot.lane.b32.xlu0 %v1906_v54, %s1982_s24  ;;  %v44_v54 = vld [vmem:[%s2373_s3 + $0x50] sm:$0xff] }
 0x2be   :  { %v298_v56 = vpop.permute.xlu0 %297 }
 0x2bf   :  { %v2144_v57 = vmul.f32 %v1904_v36, %v298_v56  ;;  %v2194_v56 = vpack.c.bf16 %v43_v53, %v42_v52 }
 0x2c1   :  { %302 = vrot.lane.b32.xlu1 %v2144_v57, %s1981_s21  ;;  %1830 = vmatpush3.bf16.msra.mxu0 %v2194_v56 }
 0x2c2   :  { %1831 = vmatprep.subr.bf16.mxu0 %v1978_v1 }
 0x333   :  { %v303_v60 = vpop.permute.xlu1 %302 }
 0x334   :  { %1664 = vmatmul.mubr.msk.f32.vlgmr.msra.gmra.mrb[2].mxu1 %vm50_vm1, %v303_v60  ;;  %v2200_v60 = vpack.c.bf16 %v45_v59, %v44_v54 }
 0x335   :  { %1824 = vmatpush3.bf16.msra.mxu1 %v2124_v51  ;;  %1674 = vmatprep.mubr.msk.f32.mxu1 %vm1979_vm0, %v1980_v4 }
 0x336   :  { %1825 = vmatprep.subr.bf16.mxu1 %v1978_v1  ;;  %1833 = vmatpush3.bf16.msra.mxu0 %v2200_v60 }
 0x337   :  { %1846 = vmatprep.subr.bf16.mxu0 %v1978_v1 }
 0x339   :  { %1827 = vmatpush3.bf16.msra.mxu1 %v2137_v55 }
 0x33a   :  { %1834 = vmatprep.subr.bf16.mxu1 %v1978_v1 }
 0x407   :  { %v372_v0 = vpop.f32.mrb[2].mxu1 }
 0x408   :  { %v379_v2 = vrot.slane %v372_v0, %v2157_v63  ;;  %v1665_v3 = vpop.f32.mrb[3].mxu1 }
 0x40a   :  { %v380_v5 = vadd.f32 %v379_v2, %v2148_v58 }
 0x40c   :  { %1907 = vtanh.f32 %v380_v5 }
 0x416   :  { %v1908_v7 = vpop.eup %1907 }
 0x417   :  { %v386_v8 = vmul.f32 %v1908_v7, %v2164_v6 }
 0x419   :  { %v387_v9 = vsel %vm50_vm1, %v386_v8, 0.0 }
 0x41a   :  { %388 = vadd.xlane.f32.xlu0 %v387_v9 }
 0x4a7   :  { %v389_v10 = vpop.xlane.xlu0 %388 }
 0x4a8   :  { %v390_v11 = vrot.slane %v389_v10, 4 }
 0x4aa   :  { %v391_v14 = vmax.f32 %v389_v10, %v390_v11 }
 0x4ac   :  { %v392_v15 = vrot.slane %v391_v14, 2 }
 0x4ae   :  { %v393_v17 = vmax.f32 %v391_v14, %v392_v15 }
 0x4b0   :  { %v394_v18 = vrot.slane %v393_v17, 1 }
 0x4b2   :  { %v395_v20 = vmax.f32 %v393_v17, %v394_v18 }
 0x4b4   :  { %v396_v21 = vsub.f32 %v389_v10, %v395_v20 }
 0x4b6   :  { %v397_v23 = vmul.f32 1.442695, %v396_v21 }
 0x4b8   :  { %1909 = vpow2.f32 %v397_v23 }
 0x4c2   :  { %v1910_v24 = vpop.eup %1909 }
 0x4c3   :  { %v399_v25 = vrot.slane %v1910_v24, 4 }
 0x4c5   :  { %v400_v27 = vadd.f32 %v1910_v24, %v399_v25 }
 0x4c7   :  { %v401_v29 = vrot.slane %v400_v27, 2 }
 0x4c9   :  { %v402_v30 = vadd.f32 %v401_v29, %v400_v27 }
 0x4cb   :  { %v403_v31 = vrot.slane %v402_v30, 1 }
 0x4cd   :  { %v404_v32 = vadd.f32 %v403_v31, %v402_v30 }
 0x4cf   :  { %1911 = vrcp.f32 %v404_v32 }
 0x4d9   :  { %v1912_v33 = vpop.eup %1911 }
 0x4da   :  { %v406_v34 = vmul.f32 %v1912_v33, %v1910_v24 }
 0x4dc   :  { %v407_v35 = vmul.f32 %v406_v34, %v2148_v58 }
 0x4de   :  { %v408_v36 = vsel %vm50_vm1, %v407_v35, 0.0 }
 0x4df   :  { %v409_v37 = vrot.slane %v408_v36, 4 }
 0x4e1   :  { %v410_v38 = vadd.f32 %v409_v37, %v408_v36 }
 0x4e3   :  { %v411_v39 = vrot.slane %v410_v38, 2 }
 0x4e5   :  { %v412_v40 = vadd.f32 %v411_v39, %v410_v38  ;;  %v2219_v38 = vld [vmem:[%s2372_s2 + $0x4] ss:$0 sm:$0xff] }
 0x4e7   :  { %v413_v41 = vrot.slane %v412_v40, 1 }
 0x4e9   :  { %v414_v43 = vadd.f32 %v413_v41, %v412_v40 }
 0x4eb   :  { %1675 = vmatmul.mubr.msk.f32.vlgmr.msra.gmra.mrb[4].mxu1 %vm50_vm1, %v414_v43 }
 0x4ec   :  { %1836 = vmatpush3.bf16.msra.mxu1 %v2046_v13  ;;  %1704 = vmatprep.mubr.msk.f32.mxu1 %vm1979_vm0, %v1980_v4 }
 0x4ed   :  { %1837 = vmatprep.subr.bf16.mxu1 %v1978_v1 }
 0x4f0   :  { %1839 = vmatpush3.bf16.msra.mxu1 %v2058_v16 }
 0x4f1   :  { %1840 = vmatprep.subr.bf16.mxu1 %v1978_v1 }
 0x4f4   :  { %1842 = vmatpush3.bf16.msra.mxu1 %v2070_v19 }
 0x4f5   :  { %1843 = vmatprep.subr.bf16.mxu1 %v1978_v1 }
 0x4f8   :  { %1845 = vmatpush3.bf16.msra.mxu1 %v2080_v22 }
 0x4f9   :  { %1858 = vmatprep.subr.bf16.mxu1 %v1978_v1 }
 0x5be   :  { %v484_v44 = vpop.f32.mrb[4].mxu1 }
 0x5bf   :  { %v491_v45 = vrot.slane %v484_v44, %v2157_v63  ;;  %v1676_v46 = vpop.f32.mrb[5].mxu1 }
 0x5c1   :  { %v492_v47 = vadd.f32 %v491_v45, %v2148_v58 }
 0x5c3   :  { %1913 = vtanh.f32 %v492_v47 }
 0x5cd   :  { %v1914_v48 = vpop.eup %1913 }
 0x5ce   :  { %v494_v49 = vmul.f32 %v1914_v48, %v2164_v6 }
 0x5d0   :  { %v495_v50 = vsel %vm50_vm1, %v494_v49, 0.0 }
 0x5d1   :  { %496 = vadd.xlane.f32.xlu1 %v495_v50 }
 0x65e   :  { %v497_v61 = vpop.xlane.xlu1 %496 }
 0x65f   :  { %v498_v62 = vrot.slane %v497_v61, 4 }
 0x661   :  { %v499_v0 = vmax.f32 %v497_v61, %v498_v62 }
 0x663   :  { %v500_v2 = vrot.slane %v499_v0, 2 }
 0x665   :  { %v501_v3 = vmax.f32 %v499_v0, %v500_v2 }
 0x667   :  { %v502_v5 = vrot.slane %v501_v3, 1 }
 0x669   :  { %v503_v7 = vmax.f32 %v501_v3, %v502_v5 }
 0x66b   :  { %v504_v8 = vsub.f32 %v497_v61, %v503_v7 }
 0x66d   :  { %v505_v9 = vmul.f32 1.442695, %v504_v8 }
 0x66f   :  { %1915 = vpow2.f32 %v505_v9 }
 0x679   :  { %v1916_v10 = vpop.eup %1915 }
 0x67a   :  { %v507_v11 = vrot.slane %v1916_v10, 4 }
 0x67c   :  { %v508_v14 = vadd.f32 %v1916_v10, %v507_v11 }
 0x67e   :  { %v509_v15 = vrot.slane %v508_v14, 2 }
 0x680   :  { %v510_v17 = vadd.f32 %v509_v15, %v508_v14 }
 0x682   :  { %v511_v18 = vrot.slane %v510_v17, 1 }
 0x684   :  { %v512_v20 = vadd.f32 %v511_v18, %v510_v17 }
 0x686   :  { %1917 = vrcp.f32 %v512_v20 }
 0x690   :  { %v1918_v21 = vpop.eup %1917 }
 0x691   :  { %v514_v23 = vmul.f32 %v1918_v21, %v1916_v10 }
 0x693   :  { %v515_v24 = vmul.f32 %v514_v23, %v2148_v58 }
 0x695   :  { %v516_v25 = vsel %vm50_vm1, %v515_v24, 0.0 }
 0x696   :  { %v517_v27 = vrot.slane %v516_v25, 4 }
 0x698   :  { %v518_v29 = vadd.f32 %v517_v27, %v516_v25 }
 0x69a   :  { %v519_v30 = vrot.slane %v518_v29, 2 }
 0x69c   :  { %v520_v31 = vadd.f32 %v519_v30, %v518_v29 }
 0x69e   :  { %v521_v32 = vrot.slane %v520_v31, 1 }
 0x6a0   :  { %v522_v33 = vadd.f32 %v521_v32, %v520_v31 }
 0x6a2   :  { %1686 = vmatmul.mubr.msk.f32.vlgmr.msra.gmra.mrb[4].mxu0 %vm50_vm1, %v522_v33 }
 0x6a3   :  { %1848 = vmatpush3.bf16.msra.mxu0 %v2124_v51  ;;  %1715 = vmatprep.mubr.msk.f32.mxu0 %vm1979_vm0, %v1980_v4 }
 0x6a4   :  { %1849 = vmatprep.subr.bf16.mxu0 %v1978_v1 }
 0x6a7   :  { %1851 = vmatpush3.bf16.msra.mxu0 %v2137_v55 }
 0x6a8   :  { %1852 = vmatprep.subr.bf16.mxu0 %v1978_v1 }
 0x775   :  { %v592_v34 = vpop.f32.mrb[4].mxu0 }
 0x776   :  { %v599_v35 = vrot.slane %v592_v34, %v2157_v63  ;;  %v1687_v36 = vpop.f32.mrb[5].mxu0 }
 0x778   :  { %v600_v37 = vadd.f32 %v599_v35, %v2092_v26 }
 0x77a   :  { %1919 = vtanh.f32 %v600_v37 }
 0x784   :  { %v1920_v39 = vpop.eup %1919 }
 0x785   :  { %v606_v40 = vmul.f32 %v1920_v39, %v2219_v38 }
 0x787   :  { %v607_v41 = vsel %vm50_vm1, %v606_v40, 0.0 }
 0x788   :  { %608 = vadd.xlane.f32.xlu0 %v607_v41 }
 0x79e   :  { %643 = vrot.lane.b32.xlu0 %v2144_v57, %s1982_s24 }
 0x815   :  { %v609_v43 = vpop.xlane.xlu0 %608 }
 0x816   :  { %v610_v44 = vrot.slane %v609_v43, 4 }
 0x818   :  { %v611_v45 = vmax.f32 %v609_v43, %v610_v44 }
 0x819   :  { %v644_v17 = vpop.permute.xlu0 %643 }
 0x81a   :  { %v612_v46 = vrot.slane %v611_v45, 2 }
 0x81c   :  { %v613_v47 = vmax.f32 %v611_v45, %v612_v46 }
 0x81e   :  { %v614_v48 = vrot.slane %v613_v47, 1 }
 0x820   :  { %v615_v49 = vmax.f32 %v613_v47, %v614_v48 }
 0x822   :  { %v616_v50 = vsub.f32 %v609_v43, %v615_v49 }
 0x824   :  { %v617_v52 = vmul.f32 1.442695, %v616_v50 }
 0x826   :  { %1921 = vpow2.f32 %v617_v52 }
 0x830   :  { %v1922_v53 = vpop.eup %1921 }
 0x831   :  { %v619_v54 = vrot.slane %v1922_v53, 4 }
 0x833   :  { %v620_v59 = vadd.f32 %v1922_v53, %v619_v54 }
 0x835   :  { %v621_v61 = vrot.slane %v620_v59, 2 }
 0x837   :  { %v622_v62 = vadd.f32 %v621_v61, %v620_v59 }
 0x839   :  { %v623_v0 = vrot.slane %v622_v62, 1 }
 0x83b   :  { %v624_v2 = vadd.f32 %v623_v0, %v622_v62 }
 0x83d   :  { %1923 = vrcp.f32 %v624_v2 }
 0x847   :  { %v1924_v3 = vpop.eup %1923 }
 0x848   :  { %v626_v57 = vmul.f32 %v1924_v3, %v1922_v53 }
 0x84a   :  { %v627_v5 = vmul.f32 %v626_v57, %v2044_v12 }
 0x84c   :  { %v628_v7 = vsel %vm50_vm1, %v627_v5, 0.0 }
 0x84d   :  { %v629_v8 = vrot.slane %v628_v7, 4 }
 0x84f   :  { %v630_v9 = vadd.f32 %v629_v8, %v628_v7 }
 0x851   :  { %v631_v10 = vrot.slane %v630_v9, 2 }
 0x853   :  { %v632_v11 = vadd.f32 %v631_v10, %v630_v9 }
 0x855   :  { %v633_v14 = vrot.slane %v632_v11, 1 }
 0x857   :  { %v2227_v15 = vadd.f32 %v633_v14, %v632_v11 }
 0x859   :  { %v646_v18 = vsel %vm50_vm1, %v2227_v15, %v644_v17 }
 0x85a   :  { %1705 = vmatmul.mubr.msk.f32.vlgmr.msra.gmra.mrb[6].mxu1 %vm199_vm2, %v646_v18 }
 0x85b   :  { %1860 = vmatpush3.bf16.msra.mxu1 %v2194_v56  ;;  %1737 = vmatprep.mubr.msk.f32.mxu1 %vm1979_vm0, %v1980_v4 }
 0x85c   :  { %1861 = vmatprep.subr.bf16.mxu1 %v1978_v1 }
 0x85f   :  { %1863 = vmatpush3.bf16.msra.mxu1 %v2200_v60 }
 0x860   :  { %1876 = vmatprep.subr.bf16.mxu1 %v1978_v1 }
 0x92d   :  { %v716_v20 = vpop.f32.mrb[6].mxu1 }
 0x92e   :  { %v717_v21 = vadd.f32 %v716_v20, %v2097_v28  ;;  %v1706_v23 = vpop.f32.mrb[7].mxu1 }
 0x930   :  { %1925 = vtanh.f32 %v717_v21  ;;  %v1523_v25 = vmul.f32 -1.442695, %v717_v21 }
 0x932   :  { %1927 = vpow2.f32 %v1523_v25 }
 0x93a   :  { %v1926_v24 = vpop.eup %1925 }
 0x93b   :  { %729 = vrot.lane.b32.xlu1 %v1926_v24, %s1982_s24 }
 0x93c   :  { %v1928_v27 = vpop.eup %1927 }
 0x93d   :  { %v723_v29 = vadd.f32 1.0, %v1928_v27 }
 0x93f   :  { %1929 = vrcp.f32 %v723_v29 }
 0x949   :  { %v1930_v30 = vpop.eup %1929 }
 0x94a   :  { %v727_v33 = vmul.f32 %v1930_v30, %v2102_v42 }
 0x9ad   :  { %v730_v31 = vpop.permute.xlu1 %729 }
 0x9ae   :  { %v732_v32 = vmul.f32 %v1930_v30, %v730_v31 }
 0x9b0   :  { %734 = vrot.lane.b32.xlu1 %v732_v32, %s1981_s21 }
 0xa22   :  { %v735_v34 = vpop.permute.xlu1 %734 }
 0xa23   :  { %v2242_v35 = vadd.f32 %v735_v34, %v727_v33 }
 0xa25   :  { %1931 = vtanh.f32 %v2242_v35 }
 0xa2f   :  { %v1932_v36 = vpop.eup %1931 }
 0xa30   :  { %740 = vrot.lane.b32.xlu0 %v1932_v36, %s1982_s24 }
 0xaa2   :  { %v741_v37 = vpop.permute.xlu0 %740 }
 0xaa3   :  { %v2246_v39 = vmul.f32 %v1930_v30, %v741_v37 }
 0xaa5   :  { %745 = vrot.lane.b32.xlu1 %v2246_v39, %s1981_s21 }
 0xb17   :  { %v746_v40 = vpop.permute.xlu1 %745 }
 0xb18   :  { %1716 = vmatmul.mubr.msk.f32.vlgmr.msra.gmra.mrb[6].mxu0 %vm50_vm1, %v746_v40 }
 0xb19   :  { %1854 = vmatpush3.bf16.msra.mxu0 %v2124_v51  ;;  %1726 = vmatprep.mubr.msk.f32.mxu0 %vm1979_vm0, %v1980_v4 }
 0xb1a   :  { %1855 = vmatprep.subr.bf16.mxu0 %v1978_v1 }
 0xb1d   :  { %1857 = vmatpush3.bf16.msra.mxu0 %v2137_v55 }
 0xb1e   :  { %1864 = vmatprep.subr.bf16.mxu0 %v1978_v1 }
 0xbeb   :  { %v815_v42 = vpop.f32.mrb[6].mxu0 }
 0xbec   :  { %v822_v41 = vrot.slane %v815_v42, %v2157_v63  ;;  %v1717_v43 = vpop.f32.mrb[7].mxu0 }
 0xbee   :  { %v823_v44 = vadd.f32 %v822_v41, %v2148_v58 }
 0xbf0   :  { %1933 = vtanh.f32 %v823_v44 }
 0xbfa   :  { %v1934_v45 = vpop.eup %1933 }
 0xbfb   :  { %v825_v46 = vmul.f32 %v1934_v45, %v2164_v6 }
 0xbfd   :  { %v826_v47 = vsel %vm50_vm1, %v825_v46, 0.0 }
 0xbfe   :  { %827 = vadd.xlane.f32.xlu0 %v826_v47 }
 0xc8b   :  { %v828_v48 = vpop.xlane.xlu0 %827 }
 0xc8c   :  { %v829_v49 = vrot.slane %v828_v48, 4 }
 0xc8e   :  { %v830_v50 = vmax.f32 %v828_v48, %v829_v49 }
 0xc90   :  { %v831_v52 = vrot.slane %v830_v50, 2 }
 0xc92   :  { %v832_v53 = vmax.f32 %v830_v50, %v831_v52 }
 0xc94   :  { %v833_v54 = vrot.slane %v832_v53, 1 }
 0xc96   :  { %v834_v59 = vmax.f32 %v832_v53, %v833_v54 }
 0xc98   :  { %v835_v61 = vsub.f32 %v828_v48, %v834_v59 }
 0xc9a   :  { %v836_v62 = vmul.f32 1.442695, %v835_v61 }
 0xc9c   :  { %1935 = vpow2.f32 %v836_v62 }
 0xca6   :  { %v1936_v0 = vpop.eup %1935 }
 0xca7   :  { %v838_v2 = vrot.slane %v1936_v0, 4 }
 0xca9   :  { %v839_v3 = vadd.f32 %v1936_v0, %v838_v2 }
 0xcab   :  { %v840_v57 = vrot.slane %v839_v3, 2 }
 0xcad   :  { %v841_v5 = vadd.f32 %v840_v57, %v839_v3 }
 0xcaf   :  { %v842_v7 = vrot.slane %v841_v5, 1 }
 0xcb1   :  { %v843_v8 = vadd.f32 %v842_v7, %v841_v5 }
 0xcb3   :  { %1937 = vrcp.f32 %v843_v8 }
 0xcbd   :  { %v1938_v9 = vpop.eup %1937 }
 0xcbe   :  { %v845_v10 = vmul.f32 %v1938_v9, %v1936_v0 }
 0xcc0   :  { %v846_v11 = vmul.f32 %v845_v10, %v2148_v58 }
 0xcc2   :  { %v847_v14 = vsel %vm50_vm1, %v846_v11, 0.0 }
 0xcc3   :  { %v848_v17 = vrot.slane %v847_v14, 4 }
 0xcc5   :  { %v849_v18 = vadd.f32 %v848_v17, %v847_v14 }
 0xcc7   :  { %v850_v20 = vrot.slane %v849_v18, 2 }
 0xcc9   :  { %v851_v21 = vadd.f32 %v850_v20, %v849_v18 }
 0xccb   :  { %v852_v23 = vrot.slane %v851_v21, 1 }
 0xccd   :  { %v853_v24 = vadd.f32 %v852_v23, %v851_v21 }
 0xccf   :  { %1727 = vmatmul.mubr.msk.f32.vlgmr.msra.gmra.mrb[8].mxu0 %vm50_vm1, %v853_v24 }
 0xcd0   :  { %1866 = vmatpush3.bf16.msra.mxu0 %v2046_v13  ;;  %1756 = vmatprep.mubr.msk.f32.mxu0 %vm1979_vm0, %v1980_v4 }
 0xcd1   :  { %1867 = vmatprep.subr.bf16.mxu0 %v1978_v1 }
 0xcd4   :  { %1869 = vmatpush3.bf16.msra.mxu0 %v2058_v16 }
 0xcd5   :  { %1870 = vmatprep.subr.bf16.mxu0 %v1978_v1 }
 0xcd8   :  { %1872 = vmatpush3.bf16.msra.mxu0 %v2070_v19 }
 0xcd9   :  { %1873 = vmatprep.subr.bf16.mxu0 %v1978_v1 }
 0xcdc   :  { %1875 = vmatpush3.bf16.msra.mxu0 %v2080_v22 }
 0xcdd   :  { %1888 = vmatprep.subr.bf16.mxu0 %v1978_v1 }
 0xda2   :  { %v923_v25 = vpop.f32.mrb[8].mxu0 }
 0xda3   :  { %v930_v13 = vrot.slane %v923_v25, %v2157_v63  ;;  %v1728_v27 = vpop.f32.mrb[9].mxu0 }
 0xda5   :  { %v931_v29 = vadd.f32 %v930_v13, %v2148_v58 }
 0xda7   :  { %1939 = vtanh.f32 %v931_v29 }
 0xdb1   :  { %v1940_v30 = vpop.eup %1939 }
 0xdb2   :  { %v933_v16 = vmul.f32 %v1940_v30, %v2164_v6 }
 0xdb4   :  { %v934_v31 = vsel %vm50_vm1, %v933_v16, 0.0 }
 0xdb5   :  { %935 = vadd.xlane.f32.xlu1 %v934_v31 }
 0xe42   :  { %v936_v19 = vpop.xlane.xlu1 %935 }
 0xe43   :  { %v937_v32 = vrot.slane %v936_v19, 4 }
 0xe45   :  { %v938_v33 = vmax.f32 %v936_v19, %v937_v32 }
 0xe47   :  { %v939_v34 = vrot.slane %v938_v33, 2 }
 0xe49   :  { %v940_v22 = vmax.f32 %v938_v33, %v939_v34 }
 0xe4b   :  { %v941_v36 = vrot.slane %v940_v22, 1 }
 0xe4d   :  { %v942_v37 = vmax.f32 %v940_v22, %v941_v36 }
 0xe4f   :  { %v943_v40 = vsub.f32 %v936_v19, %v942_v37 }
 0xe51   :  { %v944_v42 = vmul.f32 1.442695, %v943_v40 }
 0xe53   :  { %1941 = vpow2.f32 %v944_v42 }
 0xe5d   :  { %v1942_v41 = vpop.eup %1941 }
 0xe5e   :  { %v946_v43 = vrot.slane %v1942_v41, 4 }
 0xe60   :  { %v947_v44 = vadd.f32 %v1942_v41, %v946_v43 }
 0xe62   :  { %v948_v45 = vrot.slane %v947_v44, 2 }
 0xe64   :  { %v949_v46 = vadd.f32 %v948_v45, %v947_v44 }
 0xe66   :  { %v950_v47 = vrot.slane %v949_v46, 1 }
 0xe68   :  { %v951_v48 = vadd.f32 %v950_v47, %v949_v46 }
 0xe6a   :  { %1943 = vrcp.f32 %v951_v48 }
 0xe74   :  { %v1944_v49 = vpop.eup %1943 }
 0xe75   :  { %v953_v50 = vmul.f32 %v1944_v49, %v1942_v41 }
 0xe77   :  { %v954_v52 = vmul.f32 %v953_v50, %v2148_v58 }
 0xe79   :  { %v955_v53 = vsel %vm50_vm1, %v954_v52, 0.0 }
 0xe7a   :  { %v956_v54 = vrot.slane %v955_v53, 4 }
 0xe7c   :  { %v957_v59 = vadd.f32 %v956_v54, %v955_v53 }
 0xe7e   :  { %v958_v61 = vrot.slane %v957_v59, 2 }
 0xe80   :  { %v959_v62 = vadd.f32 %v958_v61, %v957_v59 }
 0xe82   :  { %v960_v0 = vrot.slane %v959_v62, 1 }
 0xe84   :  { %v961_v2 = vadd.f32 %v960_v0, %v959_v62 }
 0xe86   :  { %1738 = vmatmul.mubr.msk.f32.vlgmr.msra.gmra.mrb[8].mxu1 %vm50_vm1, %v961_v2 }
 0xe87   :  { %1878 = vmatpush3.bf16.msra.mxu1 %v2124_v51  ;;  %1767 = vmatprep.mubr.msk.f32.mxu1 %vm1979_vm0, %v1980_v4 }
 0xe88   :  { %1879 = vmatprep.subr.bf16.mxu1 %v1978_v1 }
 0xe8b   :  { %1881 = vmatpush3.bf16.msra.mxu1 %v2137_v55 }
 0xe8c   :  { %1882 = vmatprep.subr.bf16.mxu1 %v1978_v1 }
 0xf59   :  { %v1031_v3 = vpop.f32.mrb[8].mxu1 }
 0xf5a   :  { %v1038_v57 = vrot.slane %v1031_v3, %v2157_v63  ;;  %v1739_v5 = vpop.f32.mrb[9].mxu1 }
 0xf5c   :  { %v1039_v7 = vadd.f32 %v1038_v57, %v2092_v26 }
 0xf5e   :  { %1945 = vtanh.f32 %v1039_v7 }
 0xf68   :  { %v1946_v8 = vpop.eup %1945 }
 0xf69   :  { %v1041_v9 = vmul.f32 %v1946_v8, %v2219_v38 }
 0xf6b   :  { %v1042_v10 = vsel %vm50_vm1, %v1041_v9, 0.0 }
 0xf6c   :  { %1043 = vadd.xlane.f32.xlu0 %v1042_v10 }
 0xf82   :  { %1076 = vrot.lane.b32.xlu0 %v2246_v39, %s1982_s24 }
 0xff9   :  { %v1044_v11 = vpop.xlane.xlu0 %1043 }
 0xffa   :  { %v1045_v14 = vrot.slane %v1044_v11, 4 }
 0xffc   :  { %v1046_v17 = vmax.f32 %v1044_v11, %v1045_v14 }
 0xffd   :  { %v1077_v43 = vpop.permute.xlu0 %1076 }
 0xffe   :  { %v1047_v18 = vrot.slane %v1046_v17, 2 }
0x1000   :  { %v1048_v20 = vmax.f32 %v1046_v17, %v1047_v18 }
0x1002   :  { %v1049_v21 = vrot.slane %v1048_v20, 1 }
0x1004   :  { %v1050_v23 = vmax.f32 %v1048_v20, %v1049_v21 }
0x1006   :  { %v1051_v24 = vsub.f32 %v1044_v11, %v1050_v23 }
0x1008   :  { %v1052_v25 = vmul.f32 1.442695, %v1051_v24 }
0x100a   :  { %1947 = vpow2.f32 %v1052_v25 }
0x1014   :  { %v1948_v13 = vpop.eup %1947 }
0x1015   :  { %v1054_v27 = vrot.slane %v1948_v13, 4 }
0x1017   :  { %v1055_v29 = vadd.f32 %v1948_v13, %v1054_v27 }
0x1019   :  { %v1056_v30 = vrot.slane %v1055_v29, 2 }
0x101b   :  { %v1057_v16 = vadd.f32 %v1056_v30, %v1055_v29 }
0x101d   :  { %v1058_v31 = vrot.slane %v1057_v16, 1 }
0x101f   :  { %v1059_v19 = vadd.f32 %v1058_v31, %v1057_v16 }
0x1021   :  { %1949 = vrcp.f32 %v1059_v19 }
0x102b   :  { %v1950_v32 = vpop.eup %1949 }
0x102c   :  { %v1061_v39 = vmul.f32 %v1950_v32, %v1948_v13 }
0x102e   :  { %v1062_v33 = vmul.f32 %v1061_v39, %v2044_v12 }
0x1030   :  { %v1063_v34 = vsel %vm50_vm1, %v1062_v33, 0.0 }
0x1031   :  { %v1064_v22 = vrot.slane %v1063_v34, 4 }
0x1033   :  { %v1065_v36 = vadd.f32 %v1064_v22, %v1063_v34 }
0x1035   :  { %v1066_v37 = vrot.slane %v1065_v36, 2 }
0x1037   :  { %v1067_v40 = vadd.f32 %v1066_v37, %v1065_v36 }
0x1039   :  { %v1068_v42 = vrot.slane %v1067_v40, 1 }
0x103b   :  { %v2295_v41 = vadd.f32 %v1068_v42, %v1067_v40 }
0x103d   :  { %v1079_v44 = vsel %vm50_vm1, %v2295_v41, %v1077_v43 }
0x103e   :  { %1757 = vmatmul.mubr.msk.f32.vlgmr.msra.gmra.mrb[10].mxu0 %vm199_vm2, %v1079_v44  ;;  %v2330_v44 = vld [vmem:[%s2372_s2 + $0x6] sm:$0x1] }
0x103f   :  { %1890 = vmatpush3.bf16.msra.mxu0 %v2194_v56  ;;  %1789 = vmatprep.mubr.msk.f32.mxu0 %vm1979_vm0, %v1980_v4 }
0x1040   :  { %1891 = vmatprep.subr.bf16.mxu0 %v1978_v1 }
0x1043   :  { %1893 = vmatpush3.bf16.msra.mxu0 %v2200_v60 }
0x1111   :  { %v1149_v12 = vpop.f32.mrb[10].mxu0 }
0x1112   :  { %v1150_v45 = vadd.f32 %v1149_v12, %v2097_v28  ;;  %v1758_v46 = vpop.f32.mrb[11].mxu0 }
0x1114   :  { %1951 = vtanh.f32 %v1150_v45  ;;  %v1528_v48 = vmul.f32 -1.442695, %v1150_v45  ;;  %v1070_v45 = vmul.f32 %v2295_v41, %v2330_v44 }
0x1116   :  { %1953 = vpow2.f32 %v1528_v48  ;;  %v1071_v46 = vsel %vm636_vm3, %v1070_v45, 0.0 }
0x111e   :  { %v1952_v47 = vpop.eup %1951 }
0x111f   :  { %1162 = vrot.lane.b32.xlu1 %v1952_v47, %s1982_s24 }
0x1120   :  { %v1954_v49 = vpop.eup %1953 }
0x1121   :  { %v1156_v50 = vadd.f32 1.0, %v1954_v49 }
0x1123   :  { %1955 = vrcp.f32 %v1156_v50 }
0x112d   :  { %v1956_v56 = vpop.eup %1955 }
0x112e   :  { %v1160_v60 = vmul.f32 %v1956_v56, %v2242_v35 }
0x1191   :  { %v1163_v52 = vpop.permute.xlu1 %1162 }
0x1192   :  { %v1165_v53 = vmul.f32 %v1956_v56, %v1163_v52 }
0x1194   :  { %1167 = vrot.lane.b32.xlu1 %v1165_v53, %s1981_s21 }
0x1206   :  { %v1168_v54 = vpop.permute.xlu1 %1167 }
0x1207   :  { %v1170_v59 = vadd.f32 %v1168_v54, %v1160_v60 }
0x1209   :  { %1957 = vtanh.f32 %v1170_v59 }
0x1213   :  { %v1958_v28 = vpop.eup %1957 }
0x1214   :  { %1173 = vrot.lane.b32.xlu0 %v1958_v28, %s1982_s24 }
0x1286   :  { %v1174_v61 = vpop.permute.xlu0 %1173 }
0x1287   :  { %v1176_v62 = vmul.f32 %v1956_v56, %v1174_v61 }
0x1289   :  { %1178 = vrot.lane.b32.xlu1 %v1176_v62, %s1981_s21 }
0x12fb   :  { %v1179_v0 = vpop.permute.xlu1 %1178 }
0x12fc   :  { %1768 = vmatmul.mubr.msk.f32.vlgmr.msra.gmra.mrb[10].mxu1 %vm50_vm1, %v1179_v0 }
0x12fd   :  { %1884 = vmatpush3.bf16.msra.mxu1 %v2124_v51  ;;  %1778 = vmatprep.mubr.msk.f32.mxu1 %vm1979_vm0, %v1980_v4 }
0x12fe   :  { %1885 = vmatprep.subr.bf16.mxu1 %v1978_v1 }
0x1301   :  { %1887 = vmatpush3.bf16.msra.mxu1 %v2137_v55 }
0x13cf   :  { %v1248_v35 = vpop.f32.mrb[10].mxu1 }
0x13d0   :  { %v1255_v2 = vrot.slane %v1248_v35, %v2157_v63  ;;  %v1769_v3 = vpop.f32.mrb[11].mxu1 }
0x13d2   :  { %v1256_v57 = vadd.f32 %v1255_v2, %v2148_v58 }
0x13d4   :  { %1959 = vtanh.f32 %v1256_v57 }
0x13de   :  { %v1960_v5 = vpop.eup %1959 }
0x13df   :  { %v1258_v7 = vmul.f32 %v1960_v5, %v2164_v6 }
0x13e1   :  { %v1259_v8 = vsel %vm50_vm1, %v1258_v7, 0.0 }
0x13e2   :  { %1260 = vadd.xlane.f32.xlu0 %v1259_v8 }
0x146f   :  { %v1261_v51 = vpop.xlane.xlu0 %1260 }
0x1470   :  { %v1262_v9 = vrot.slane %v1261_v51, 4 }
0x1472   :  { %v1263_v4 = vmax.f32 %v1261_v51, %v1262_v9 }
0x1474   :  { %v1264_v10 = vrot.slane %v1263_v4, 2 }
0x1476   :  { %v1265_v1 = vmax.f32 %v1263_v4, %v1264_v10 }
0x1478   :  { %v1266_v11 = vrot.slane %v1265_v1, 1 }
0x147a   :  { %v1267_v55 = vmax.f32 %v1265_v1, %v1266_v11 }
0x147c   :  { %v1268_v14 = vsub.f32 %v1261_v51, %v1267_v55 }
0x147e   :  { %v1269_v17 = vmul.f32 1.442695, %v1268_v14 }
0x1480   :  { %1961 = vpow2.f32 %v1269_v17 }
0x148a   :  { %v1962_v18 = vpop.eup %1961 }
0x148b   :  { %v1271_v20 = vrot.slane %v1962_v18, 4 }
0x148d   :  { %v1272_v21 = vadd.f32 %v1962_v18, %v1271_v20 }
0x148f   :  { %v1273_v23 = vrot.slane %v1272_v21, 2 }
0x1491   :  { %v1274_v24 = vadd.f32 %v1273_v23, %v1272_v21  ;;  %v635_v23 = vmul.f32 %v2227_v15, %v2330_v44 }
0x1493   :  { %v1275_v25 = vrot.slane %v1274_v24, 1 }
0x1495   :  { %v1276_v13 = vadd.f32 %v1275_v25, %v1274_v24  ;;  %v637_v24 = vsel %vm636_vm3, %v635_v23, 0.0 }
0x1497   :  { %1963 = vrcp.f32 %v1276_v13 }
0x14a1   :  { %v1964_v27 = vpop.eup %1963 }
0x14a2   :  { %v1278_v29 = vmul.f32 %v1964_v27, %v1962_v18 }
0x14a4   :  { %v1279_v30 = vmul.f32 %v1278_v29, %v2148_v58 }
0x14a6   :  { %v1280_v16 = vsel %vm50_vm1, %v1279_v30, 0.0 }
0x14a7   :  { %v1281_v31 = vrot.slane %v1280_v16, 4 }
0x14a9   :  { %v1282_v19 = vadd.f32 %v1281_v31, %v1280_v16 }
0x14ab   :  { %v1283_v32 = vrot.slane %v1282_v19, 2 }
0x14ad   :  { %v1284_v39 = vadd.f32 %v1283_v32, %v1282_v19 }
0x14af   :  { %v1285_v33 = vrot.slane %v1284_v39, 1 }
0x14b1   :  { %v1286_v34 = vadd.f32 %v1285_v33, %v1284_v39 }
0x14b3   :  { %1779 = vmatmul.mubr.msk.f32.vlgmr.msra.gmra.mrb[12].mxu1 %vm50_vm1, %v1286_v34 }
0x1586   :  { %v1356_v22 = vpop.f32.mrb[12].mxu1 }
0x1587   :  { %v1363_v36 = vrot.slane %v1356_v22, %v2157_v63  ;;  %v1780_v37 = vpop.f32.mrb[13].mxu1 }
0x1589   :  { %v1364_v40 = vadd.f32 %v1363_v36, %v2148_v58 }
0x158b   :  { %1965 = vtanh.f32 %v1364_v40 }
0x1595   :  { %v1966_v42 = vpop.eup %1965 }
0x1596   :  { %v1366_v43 = vmul.f32 %v1966_v42, %v2164_v6  ;;  %v2339_v6 = vld [vmem:[%s2372_s2 + $0x7] sm:$0x1] }
0x1597   :  { %v1977_v42 = vld [vmem:[%s2375_s0] sm:$0xff] }
0x1598   :  { %v1367_v12 = vsel %vm50_vm1, %v1366_v43, 0.0 }
0x1599   :  { %1368 = vadd.xlane.f32.xlu1 %v1367_v12 }
0x159d   :  { %1072 = vadd.xlane.f32.xlu1 %v1071_v46 }
0x1626   :  { %v1369_v47 = vpop.xlane.xlu1 %1368 }
0x1627   :  { %v1370_v48 = vrot.slane %v1369_v47, 4 }
0x1629   :  { %v1371_v49 = vmax.f32 %v1369_v47, %v1370_v48 }
0x162a   :  { %v1073_v50 = vpop.xlane.xlu1 %1072 }
0x162b   :  { %v1372_v56 = vrot.slane %v1371_v49, 2  ;;  %v1074_v52 = vadd.f32 %v1073_v50, %v2339_v6 }
0x162d   :  { %v1373_v53 = vmax.f32 %v1371_v49, %v1372_v56  ;;  %1075 = vst.msk [vmem:[%s2376_s4 + $0x1] sm:$0x1] %vm641_vm4, %v1074_v52 }
0x162f   :  { %v1374_v41 = vrot.slane %v1373_v53, 1 }
0x1631   :  { %v1375_v60 = vmax.f32 %v1373_v53, %v1374_v41 }
0x1633   :  { %v1376_v54 = vsub.f32 %v1369_v47, %v1375_v60 }
0x1635   :  { %v1377_v59 = vmul.f32 1.442695, %v1376_v54 }
0x1637   :  { %1967 = vpow2.f32 %v1377_v59 }
0x1641   :  { %v1968_v28 = vpop.eup %1967 }
0x1642   :  { %v1379_v61 = vrot.slane %v1968_v28, 4 }
0x1644   :  { %v1380_v62 = vadd.f32 %v1968_v28, %v1379_v61 }
0x1646   :  { %v1381_v0 = vrot.slane %v1380_v62, 2 }
0x1648   :  { %v1382_v35 = vadd.f32 %v1381_v0, %v1380_v62 }
0x164a   :  { %v1383_v2 = vrot.slane %v1382_v35, 1 }
0x164c   :  { %v1384_v3 = vadd.f32 %v1383_v2, %v1382_v35 }
0x164e   :  { %1969 = vrcp.f32 %v1384_v3 }
0x1658   :  { %v1970_v57 = vpop.eup %1969 }
0x1659   :  { %v1386_v5 = vmul.f32 %v1970_v57, %v1968_v28 }
0x165b   :  { %v1387_v7 = vmul.f32 %v1386_v5, %v2148_v58 }
0x165d   :  { %v1388_v8 = vsel %vm50_vm1, %v1387_v7, 0.0 }
0x165e   :  { %v1389_v51 = vrot.slane %v1388_v8, 4 }
0x1660   :  { %v1390_v9 = vadd.f32 %v1389_v51, %v1388_v8 }
0x1662   :  { %v1391_v4 = vrot.slane %v1390_v9, 2 }
0x1664   :  { %v1392_v10 = vadd.f32 %v1391_v4, %v1390_v9 }
0x1666   :  { %v1393_v1 = vrot.slane %v1392_v10, 1 }
0x1668   :  { %v1394_v11 = vadd.f32 %v1393_v1, %v1392_v10 }
0x166a   :  { %1790 = vmatmul.mubr.msk.f32.vlgmr.msra.gmra.mrb[12].mxu0 %vm50_vm1, %v1394_v11 }
0x173d   :  { %v1464_v55 = vpop.f32.mrb[12].mxu0 }
0x173e   :  { %v1471_v14 = vrot.slane %v1464_v55, %v2157_v63  ;;  %v1791_v17 = vpop.f32.mrb[13].mxu0 }
0x1740   :  { %v1472_v18 = vadd.f32 %v1471_v14, %v2092_v26 }
0x1742   :  { %1971 = vtanh.f32 %v1472_v18 }
0x174c   :  { %v1972_v20 = vpop.eup %1971 }
0x174d   :  { %v1474_v58 = vmul.f32 %v1972_v20, %v2219_v38 }
0x174f   :  { %v1475_v21 = vsel %vm50_vm1, %v1474_v58, 0.0 }
0x1750   :  { %1476 = vadd.xlane.f32.xlu0 %v1475_v21 }
0x1754   :  { %638 = vadd.xlane.f32.xlu0 %v637_v24 }
0x17dd   :  { %v1477_v25 = vpop.xlane.xlu0 %1476 }
0x17de   :  { %v1478_v13 = vrot.slane %v1477_v25, 4 }
0x17e0   :  { %v1479_v27 = vmax.f32 %v1477_v25, %v1478_v13 }
0x17e1   :  { %v639_v63 = vpop.xlane.xlu0 %638 }
0x17e2   :  { %v1480_v29 = vrot.slane %v1479_v27, 2  ;;  %v640_v26 = vadd.f32 %v639_v63, %v2339_v6 }
0x17e4   :  { %v1481_v30 = vmax.f32 %v1479_v27, %v1480_v29  ;;  %642 = vst.msk [vmem:[%s2376_s4] sm:$0x1] %vm641_vm4, %v640_v26 }
0x17e6   :  { %v1482_v38 = vrot.slane %v1481_v30, 1 }
0x17e8   :  { %v1483_v16 = vmax.f32 %v1481_v30, %v1482_v38 }
0x17ea   :  { %v1484_v15 = vsub.f32 %v1477_v25, %v1483_v16 }
0x17ec   :  { %v1485_v31 = vmul.f32 1.442695, %v1484_v15 }
0x17ee   :  { %1973 = vpow2.f32 %v1485_v31 }
0x17f8   :  { %v1974_v19 = vpop.eup %1973 }
0x17f9   :  { %v1487_v32 = vrot.slane %v1974_v19, 4 }
0x17fb   :  { %v1488_v39 = vadd.f32 %v1974_v19, %v1487_v32 }
0x17fd   :  { %v1489_v33 = vrot.slane %v1488_v39, 2 }
0x17ff   :  { %v1490_v34 = vadd.f32 %v1489_v33, %v1488_v39 }
0x1801   :  { %v1491_v22 = vrot.slane %v1490_v34, 1 }
0x1803   :  { %v1492_v36 = vadd.f32 %v1491_v22, %v1490_v34 }
0x1805   :  { %1975 = vrcp.f32 %v1492_v36 }
0x180f   :  { %v1976_v37 = vpop.eup %1975 }
0x1810   :  { %v1494_v40 = vmul.f32 %v1976_v37, %v1974_v19 }
0x1812   :  { %v1495_v43 = vmul.f32 %v1977_v42, %v1494_v40 }
0x1814   :  { %v1496_v12 = vsel %vm50_vm1, %v1495_v43, 0.0 }
0x1815   :  { %v1497_v45 = vrot.slane %v1496_v12, 4 }
0x1817   :  { %v1498_v46 = vadd.f32 %v1497_v45, %v1496_v12 }
0x1819   :  { %v1499_v47 = vrot.slane %v1498_v46, 2 }
0x181b   :  { %v1500_v48 = vadd.f32 %v1499_v47, %v1498_v46 }
0x181d   :  { %v1501_v49 = vrot.slane %v1500_v48, 1 }
0x181f   :  { %v1502_v50 = vadd.f32 %v1501_v49, %v1500_v48 }
0x1821   :  { %v1503_v56 = vmul.f32 %v1502_v50, %v2330_v44 }
0x1823   :  { %v1504_v52 = vsel %vm636_vm3, %v1503_v56, 0.0 }
0x1824   :  { %1505 = vadd.xlane.f32.xlu0 %v1504_v52 }
0x18b1   :  { %v1506_v53 = vpop.xlane.xlu0 %1505 }
0x18b2   :  { %v1507_v41 = vadd.f32 %v1506_v53, %v2339_v6 }
0x18b4   :  { %1508 = vst.msk [vmem:[%s2376_s4 + $0x2] sm:$0x1] %vm641_vm4, %v1507_v41 }

</bundles_post_ra>
